<compile_context>
chip_gen: v7x
topology: tpu7x:2x2x1
jax: 0.10.0
libtpu: 0.0.40
codegen_flags: <defaults>
</compile_context>

<pallas_src>
import functools

import jax
import jax.numpy as jnp
from jax.experimental import pallas as pl
from jax.experimental.pallas import tpu as pltpu


# ----------------------------- Pallas kernels ------------------------------

def conv_stats_kernel(x_ref, w_ref, b_ref, mask_ref, y_ref, s1_ref, s2_ref,
                      *, tap_offsets, add_bias):
    """Per-image fused conv (+optional bias) + BN partial statistics.

    x_ref:    (1, Lpad, Cin)   f32   flattened, padded, phase-ordered input
    w_ref:    (KH*KW, Cout, Cin) bf16
    b_ref:    (Cout, 1)        f32   conv bias (used only when add_bias)
    mask_ref: (1, Lout)        f32   1.0 on valid output columns, 0.0 on junk
    y_ref:    (1, Cout, Lout)  f32   conv output (channels on sublanes, lane-dense)
    s1_ref:   (1, Cout, 1)     f32   masked per-image sum
    s2_ref:   (1, Cout, 1)     f32   masked per-image sum of squares
    """
    cout = y_ref.shape[1]
    lout = y_ref.shape[2]

    acc = jnp.zeros((cout, lout), jnp.float32)
    # KH*KW accumulated MXU matmuls over shifted windows (fused im2col).
    for t, off in enumerate(tap_offsets):
        win = x_ref[0, pl.ds(off, lout), :].astype(jnp.bfloat16)   # (Lout, Cin)
        # (Cout, Cin) x (Lout, Cin) contracting the minor dims -> (Cout, Lout)
        acc = acc + jax.lax.dot_general(
            w_ref[t], win,
            dimension_numbers=(((1,), (1,)), ((), ())),
            preferred_element_type=jnp.float32)

    if add_bias:                      # only when BN is disabled (else cancelled)
        acc = acc + b_ref[...]

    y_ref[0] = acc

    # BN partial statistics from the f32 accumulator (junk columns masked out).
    m = mask_ref[...]                                   # (1, Lout)
    s1_ref[0] = jnp.sum(acc * m, axis=1, keepdims=True)
    s2_ref[0] = jnp.sum(acc * acc * m, axis=1, keepdims=True)


def bn_apply_kernel(y_ref, scale_ref, shift_ref, o_ref):
    # y_ref: (1, Cout, Lout) f32; scale/shift: (Cout, 1) f32
    o_ref[0] = y_ref[0] * scale_ref[...] + shift_ref[...]


# ------------------------------- wrapper ------------------------------------

def _ceil_div(a, b):
    return -(-a // b)


def _prepare_input(x, kh, kw, stride, padding):
    """NCHW -> (N, Lpad, Cin) flattened/phase-ordered padded input (f32).

    Returns (xr, tap_offsets, oh, ow, wq, lout, lpad).  For every kernel tap
    the needed window is the contiguous slice xr[:, off : off + lout, :].
    """
    n, c, h, w = x.shape
    s = stride
    oh = (h + 2 * padding - kh) // s + 1
    ow = (w + 2 * padding - kw) // s + 1
    qi_max = (kh - 1) // s
    qj_max = (kw - 1) // s
    hq = max(_ceil_div(h + 2 * padding, s), oh + qi_max)
    wq = max(_ceil_div(w + 2 * padding, s), ow + qj_max)
    hp, wp = hq * s, wq * s

    xp = jnp.pad(x, ((0, 0), (0, 0),
                     (padding, hp - h - padding),
                     (padding, wp - w - padding)))
    # (N,C,Hp,Wp) -> (N,C,Hq,s,Wq,s) -> (N,s,s,Hq,Wq,C) -> (N, s*s*Hq*Wq, C)
    xr = xp.reshape(n, c, hq, s, wq, s)
    xr = jnp.transpose(xr, (0, 3, 5, 2, 4, 1))
    xr = xr.reshape(n, s * s * hq * wq, c)

    lout = oh * wq
    offs = []
    for ki in range(kh):
        for kj in range(kw):
            qi, ri = ki // s, ki % s
            qj, rj = kj // s, kj % s
            offs.append((ri * s + rj) * hq * wq + qi * wq + qj)

    lpad = _ceil_div(max(offs) + lout, 8) * 8
    xr = jnp.pad(xr, ((0, 0), (0, lpad - s * s * hq * wq), (0, 0)))
    return xr, tuple(offs), oh, ow, wq, lout, lpad


@functools.partial(jax.jit, static_argnames=("stride", "padding", "bn"))
def conv_forward(x, weight, bias, gamma, beta, *, stride, padding, bn=True):
    # x: (N, Cin, H, W)   weight: (Cout, Cin, KH, KW)   bias/gamma/beta: (Cout,)
    n, cin, h, w = x.shape
    cout, _, kh, kw = weight.shape

    xr, offs, oh, ow, wq, lout, lpad = _prepare_input(x, kh, kw, stride, padding)
    xr = xr.astype(jnp.float32)

    # (Cout, Cin, KH, KW) -> (KH*KW, Cout, Cin), bf16 MXU operands.
    w_taps = jnp.transpose(weight, (2, 3, 0, 1)).reshape(kh * kw, cout, cin)
    w_taps = w_taps.astype(jnp.bfloat16)
    bias2 = bias.reshape(cout, 1).astype(jnp.float32)

    # Valid-column mask (junk columns come from the Wq >= OW row pitch).
    cols = jnp.arange(lout, dtype=jnp.int32) % wq
    mask = (cols < ow).astype(jnp.float32).reshape(1, lout)

    cparams = pltpu.CompilerParams(
        dimension_semantics=("parallel",),
        vmem_limit_bytes=32 * 1024 * 1024)

    # ---- Pallas fused conv (+ BN partial stats), one image per grid step ----
    y, s1, s2 = pl.pallas_call(
        functools.partial(conv_stats_kernel,
                          tap_offsets=offs, add_bias=not bn),
        out_shape=(
            jax.ShapeDtypeStruct((n, cout, lout), jnp.float32),
            jax.ShapeDtypeStruct((n, cout, 1), jnp.float32),
            jax.ShapeDtypeStruct((n, cout, 1), jnp.float32),
        ),
        grid=(n,),
        in_specs=[
            pl.BlockSpec((1, lpad, cin), lambda i: (i, 0, 0)),
            pl.BlockSpec((kh * kw, cout, cin), lambda i: (0, 0, 0)),
            pl.BlockSpec((cout, 1), lambda i: (0, 0)),
            pl.BlockSpec((1, lout), lambda i: (0, 0)),
        ],
        out_specs=(
            pl.BlockSpec((1, cout, lout), lambda i: (i, 0, 0)),
            pl.BlockSpec((1, cout, 1), lambda i: (i, 0, 0)),
            pl.BlockSpec((1, cout, 1), lambda i: (i, 0, 0)),
        ),
        compiler_params=cparams,
    )(xr, w_taps, bias2, mask)

    if bn:
        # ---- tiny cross-image reduction of the fused statistics (f32) ------
        count = float(n * oh * ow)
        s1_tot = jnp.sum(s1[..., 0], axis=0)                    # (Cout,)
        s2_tot = jnp.sum(s2[..., 0], axis=0)
        mean = s1_tot / count
        var = jnp.maximum(s2_tot / count - mean * mean, 0.0)    # biased (training)
        inv = jax.lax.rsqrt(var + 1e-5)
        scale = (gamma * inv).astype(jnp.float32).reshape(cout, 1)
        shift = (beta - mean * gamma * inv).astype(jnp.float32).reshape(cout, 1)

        # ---- Pallas BN apply, tiled per image, lane-dense -------------------
        y = pl.pallas_call(
            bn_apply_kernel,
            out_shape=jax.ShapeDtypeStruct((n, cout, lout), jnp.float32),
            grid=(n,),
            in_specs=[
                pl.BlockSpec((1, cout, lout), lambda i: (i, 0, 0)),
                pl.BlockSpec((cout, 1), lambda i: (0, 0)),
                pl.BlockSpec((cout, 1), lambda i: (0, 0)),
            ],
            out_specs=pl.BlockSpec((1, cout, lout), lambda i: (i, 0, 0)),
            compiler_params=cparams,
        )(y, scale, shift)

    # (N, Cout, OH*Wq) -> (N, Cout, OH, Wq) -> drop junk columns -> NCHW.
    out = y.reshape(n, cout, oh, wq)[:, :, :, :ow]
    return out


# ---------------------------- pure-JAX reference -----------------------------

def conv_forward_ref(x, weight, bias, gamma, beta, *, stride, padding, bn=True):
    y = jax.lax.conv_general_dilated(
        x, weight, window_strides=(stride, stride),
        padding=[(padding, padding), (padding, padding)],
        dimension_numbers=("NCHW", "OIHW", "NCHW"))
    y = y + bias.reshape(1, -1, 1, 1)
    if bn:
        mean = jnp.mean(y, axis=(0, 2, 3), keepdims=True)
        var = jnp.mean((y - mean) ** 2, axis=(0, 2, 3), keepdims=True)
        y = (y - mean) * jax.lax.rsqrt(var + 1e-5)
        y = y * gamma.reshape(1, -1, 1, 1) + beta.reshape(1, -1, 1, 1)
    return y


# --------------------------------- main --------------------------------------

if __name__ == "__main__":
    # Module config: Conv(dim_in=4, dim_out=8, kernel_size=3, stride=1, padding=1)
    dim_in, dim_out, ksz, stride, padding = 4, 8, 3, 1, 1
    N, H, W = 2, 16, 16

    key = jax.random.PRNGKey(0)
    kx, kw_, kb = jax.random.split(key, 3)

    x = jax.random.normal(kx, (N, dim_in, H, W), dtype=jnp.float32)
    weight = 0.1 * jax.random.normal(kw_, (dim_out, dim_in, ksz, ksz), jnp.float32)
    bias = 0.1 * jax.random.normal(kb, (dim_out,), jnp.float32)
    gamma = jnp.ones((dim_out,), jnp.float32)   # BatchNorm2d default weight init
    beta = jnp.zeros((dim_out,), jnp.float32)   # BatchNorm2d default bias init

    out = conv_forward(x, weight, bias, gamma, beta,
                       stride=stride, padding=padding, bn=True)
    out = jax.block_until_ready(out)
    assert out.shape == (N, dim_out, H, W), out.shape

    # Tight check against a reference that sees the same bf16-rounded MXU
    # operands (f32 accumulation in both paths).
    xb = x.astype(jnp.bfloat16).astype(jnp.float32)
    wb = weight.astype(jnp.bfloat16).astype(jnp.float32)
    ref_bf16 = conv_forward_ref(xb, wb, bias, gamma, beta,
                                stride=stride, padding=padding, bn=True)
    assert jnp.allclose(out, ref_bf16, rtol=2e-3, atol=2e-3), \
        float(jnp.max(jnp.abs(out - ref_bf16)))

    # Loose check against the full-f32 reference (bf16 MXU operand rounding).
    ref_f32 = conv_forward_ref(x, weight, bias, gamma, beta,
                               stride=stride, padding=padding, bn=True)
    assert jnp.allclose(out, ref_f32, rtol=5e-2, atol=5e-2), \
        float(jnp.max(jnp.abs(out - ref_f32)))

    # Also exercise the bn=False path (conv + bias only).
    out_nobn = conv_forward(x, weight, bias, gamma, beta,
                            stride=stride, padding=padding, bn=False)
    out_nobn = jax.block_until_ready(out_nobn)
    ref_nobn = conv_forward_ref(xb, wb, bias, gamma, beta,
                                stride=stride, padding=padding, bn=False)
    assert jnp.allclose(out_nobn, ref_nobn, rtol=2e-3, atol=2e-3), \
        float(jnp.max(jnp.abs(out_nobn - ref_nobn)))

    print("KERNEL_OK")
</pallas_src>

<mosaic_0001>
module attributes {stable_mosaic.version = 11 : i64} {
  func.func @bn_apply_kernel(%arg0: i32, %arg1: memref<1x8x288xf32, #tpu.memory_space<vmem>>, %arg2: memref<8x1xf32, #tpu.memory_space<vmem>>, %arg3: memref<8x1xf32, #tpu.memory_space<vmem>>, %arg4: memref<1x8x288xf32, #tpu.memory_space<vmem>>) attributes {dimension_semantics = [#tpu.dimension_semantics<parallel>], iteration_bounds = array<i64: 2>, scalar_prefetch = 0 : i64, scratch_operands = 0 : i64, tpu.core_type = #tpu.core_type<tc>, window_params = [{transform_indices = @transform_0, window_bounds = array<i64: 1, 8, 288>}, {pipeline_mode = #tpu.pipeline_mode<synchronous>, transform_indices = @transform_1, window_bounds = array<i64: 8, 1>}, {pipeline_mode = #tpu.pipeline_mode<synchronous>, transform_indices = @transform_2, window_bounds = array<i64: 8, 1>}, {transform_indices = @transform_3, window_bounds = array<i64: 1, 8, 288>}]} {
    %c0 = arith.constant 0 : index
    %c0_0 = arith.constant 0 : index
    %c0_1 = arith.constant 0 : index
    %0 = vector.load %arg1[%c0, %c0_0, %c0_1] : memref<1x8x288xf32, #tpu.memory_space<vmem>>, vector<1x8x288xf32>
    %1 = vector.shape_cast %0 : vector<1x8x288xf32> to vector<8x288xf32>
    %c0_2 = arith.constant 0 : index
    %c0_3 = arith.constant 0 : index
    %2 = vector.load %arg2[%c0_2, %c0_3] : memref<8x1xf32, #tpu.memory_space<vmem>>, vector<8x1xf32>
    %3 = vector.broadcast %2 : vector<8x1xf32> to vector<8x288xf32>
    %4 = arith.mulf %1, %3 : vector<8x288xf32>
    %c0_4 = arith.constant 0 : index
    %c0_5 = arith.constant 0 : index
    %5 = vector.load %arg3[%c0_4, %c0_5] : memref<8x1xf32, #tpu.memory_space<vmem>>, vector<8x1xf32>
    %6 = vector.broadcast %5 : vector<8x1xf32> to vector<8x288xf32>
    %7 = arith.addf %4, %6 : vector<8x288xf32>
    %c0_6 = arith.constant 0 : index
    %c0_7 = arith.constant 0 : index
    %c0_8 = arith.constant 0 : index
    %8 = vector.load %arg4[%c0_6, %c0_7, %c0_8] : memref<1x8x288xf32, #tpu.memory_space<vmem>>, vector<1x8x288xf32>
    %9 = vector.shape_cast %8 : vector<1x8x288xf32> to vector<8x288xf32>
    %10 = vector.shape_cast %7 : vector<8x288xf32> to vector<1x8x288xf32>
    tpu.vector_store %arg4[%c0_6, %c0_7, %c0_8], %10 {strides = array<i32>} : memref<1x8x288xf32, #tpu.memory_space<vmem>>, vector<1x8x288xf32>,
    return
  }
  func.func @transform_0(%arg0: i32) -> (i32, i32, i32) {
    %c0_i32 = arith.constant 0 : i32
    %c0_i32_0 = arith.constant 0 : i32
    %c0_i32_1 = arith.constant 0 : i32
    return %arg0, %c0_i32, %c0_i32_0 : i32, i32, i32
  }
  func.func @transform_1(%arg0: i32) -> (i32, i32) {
    %c0_i32 = arith.constant 0 : i32
    %c0_i32_0 = arith.constant 0 : i32
    %c0_i32_1 = arith.constant 0 : i32
    return %c0_i32, %c0_i32_0 : i32, i32
  }
  func.func @transform_2(%arg0: i32) -> (i32, i32) {
    %c0_i32 = arith.constant 0 : i32
    %c0_i32_0 = arith.constant 0 : i32
    %c0_i32_1 = arith.constant 0 : i32
    return %c0_i32, %c0_i32_0 : i32, i32
  }
  func.func @transform_3(%arg0: i32) -> (i32, i32, i32) {
    %c0_i32 = arith.constant 0 : i32
    %c0_i32_0 = arith.constant 0 : i32
    %c0_i32_1 = arith.constant 0 : i32
    return %arg0, %c0_i32, %c0_i32_0 : i32, i32, i32
  }
}

module attributes {stable_mosaic.version = 11 : i64} {
  func.func @conv_stats_kernel(%arg0: i32, %arg1: memref<1x328x4xf32, #tpu.memory_space<vmem>>, %arg2: memref<9x8x4xbf16, #tpu.memory_space<vmem>>, %arg3: memref<8x1xf32, #tpu.memory_space<vmem>>, %arg4: memref<1x288xf32, #tpu.memory_space<vmem>>, %arg5: memref<1x8x288xf32, #tpu.memory_space<vmem>>, %arg6: memref<1x8x1xf32, #tpu.memory_space<vmem>>, %arg7: memref<1x8x1xf32, #tpu.memory_space<vmem>>) attributes {dimension_semantics = [#tpu.dimension_semantics<parallel>], iteration_bounds = array<i64: 2>, scalar_prefetch = 0 : i64, scratch_operands = 0 : i64, tpu.core_type = #tpu.core_type<tc>, window_params = [{transform_indices = @transform_0, window_bounds = array<i64: 1, 328, 4>}, {pipeline_mode = #tpu.pipeline_mode<synchronous>, transform_indices = @transform_1, window_bounds = array<i64: 9, 8, 4>}, {pipeline_mode = #tpu.pipeline_mode<synchronous>, transform_indices = @transform_2, window_bounds = array<i64: 8, 1>}, {pipeline_mode = #tpu.pipeline_mode<synchronous>, transform_indices = @transform_3, window_bounds = array<i64: 1, 288>}, {transform_indices = @transform_4, window_bounds = array<i64: 1, 8, 288>}, {transform_indices = @transform_5, window_bounds = array<i64: 1, 8, 1>}, {transform_indices = @transform_6, window_bounds = array<i64: 1, 8, 1>}]} {
    %cst = arith.constant 0.000000e+00 : f32
    %0 = vector.broadcast %cst : f32 to vector<8x288xf32>
    %c0 = arith.constant 0 : index
    %c0_0 = arith.constant 0 : index
    %c0_1 = arith.constant 0 : index
    %1 = vector.load %arg1[%c0, %c0_0, %c0_1] : memref<1x328x4xf32, #tpu.memory_space<vmem>>, vector<1x288x4xf32>
    %2 = vector.shape_cast %1 : vector<1x288x4xf32> to vector<288x4xf32>
    %3 = arith.truncf %2 : vector<288x4xf32> to vector<288x4xbf16>
    %c0_2 = arith.constant 0 : index
    %c0_3 = arith.constant 0 : index
    %c0_4 = arith.constant 0 : index
    %4 = vector.load %arg2[%c0_2, %c0_3, %c0_4] : memref<9x8x4xbf16, #tpu.memory_space<vmem>>, vector<1x8x4xbf16>
    %5 = vector.shape_cast %4 : vector<1x8x4xbf16> to vector<8x4xbf16>
    %cst_5 = arith.constant dense<0.000000e+00> : vector<8x288xf32>
    %6 = tpu.matmul %5, %3, %cst_5 {dimension_numbers = #tpu.dot_dimension_numbers<[1], [1], [0], [0], [0, 0, 1, 0], [], []>} : vector<8x4xbf16>, vector<288x4xbf16>, vector<8x288xf32> -> vector<8x288xf32>
    %7 = arith.addf %0, %6 : vector<8x288xf32>
    %c0_6 = arith.constant 0 : index
    %c1 = arith.constant 1 : index
    %c0_7 = arith.constant 0 : index
    %8 = vector.load %arg1[%c0_6, %c1, %c0_7] : memref<1x328x4xf32, #tpu.memory_space<vmem>>, vector<1x288x4xf32>
    %9 = vector.shape_cast %8 : vector<1x288x4xf32> to vector<288x4xf32>
    %10 = arith.truncf %9 : vector<288x4xf32> to vector<288x4xbf16>
    %c1_8 = arith.constant 1 : index
    %c0_9 = arith.constant 0 : index
    %c0_10 = arith.constant 0 : index
    %11 = vector.load %arg2[%c1_8, %c0_9, %c0_10] : memref<9x8x4xbf16, #tpu.memory_space<vmem>>, vector<1x8x4xbf16>
    %12 = vector.shape_cast %11 : vector<1x8x4xbf16> to vector<8x4xbf16>
    %cst_11 = arith.constant dense<0.000000e+00> : vector<8x288xf32>
    %13 = tpu.matmul %12, %10, %cst_11 {dimension_numbers = #tpu.dot_dimension_numbers<[1], [1], [0], [0], [0, 0, 1, 0], [], []>} : vector<8x4xbf16>, vector<288x4xbf16>, vector<8x288xf32> -> vector<8x288xf32>
    %14 = arith.addf %7, %13 : vector<8x288xf32>
    %c0_12 = arith.constant 0 : index
    %c2 = arith.constant 2 : index
    %c0_13 = arith.constant 0 : index
    %15 = vector.load %arg1[%c0_12, %c2, %c0_13] : memref<1x328x4xf32, #tpu.memory_space<vmem>>, vector<1x288x4xf32>
    %16 = vector.shape_cast %15 : vector<1x288x4xf32> to vector<288x4xf32>
    %17 = arith.truncf %16 : vector<288x4xf32> to vector<288x4xbf16>
    %c2_14 = arith.constant 2 : index
    %c0_15 = arith.constant 0 : index
    %c0_16 = arith.constant 0 : index
    %18 = vector.load %arg2[%c2_14, %c0_15, %c0_16] : memref<9x8x4xbf16, #tpu.memory_space<vmem>>, vector<1x8x4xbf16>
    %19 = vector.shape_cast %18 : vector<1x8x4xbf16> to vector<8x4xbf16>
    %cst_17 = arith.constant dense<0.000000e+00> : vector<8x288xf32>
    %20 = tpu.matmul %19, %17, %cst_17 {dimension_numbers = #tpu.dot_dimension_numbers<[1], [1], [0], [0], [0, 0, 1, 0], [], []>} : vector<8x4xbf16>, vector<288x4xbf16>, vector<8x288xf32> -> vector<8x288xf32>
    %21 = arith.addf %14, %20 : vector<8x288xf32>
    %c0_18 = arith.constant 0 : index
    %c18 = arith.constant 18 : index
    %c0_19 = arith.constant 0 : index
    %22 = vector.load %arg1[%c0_18, %c18, %c0_19] : memref<1x328x4xf32, #tpu.memory_space<vmem>>, vector<1x288x4xf32>
    %23 = vector.shape_cast %22 : vector<1x288x4xf32> to vector<288x4xf32>
    %24 = arith.truncf %23 : vector<288x4xf32> to vector<288x4xbf16>
    %c3 = arith.constant 3 : index
    %c0_20 = arith.constant 0 : index
    %c0_21 = arith.constant 0 : index
    %25 = vector.load %arg2[%c3, %c0_20, %c0_21] : memref<9x8x4xbf16, #tpu.memory_space<vmem>>, vector<1x8x4xbf16>
    %26 = vector.shape_cast %25 : vector<1x8x4xbf16> to vector<8x4xbf16>
    %cst_22 = arith.constant dense<0.000000e+00> : vector<8x288xf32>
    %27 = tpu.matmul %26, %24, %cst_22 {dimension_numbers = #tpu.dot_dimension_numbers<[1], [1], [0], [0], [0, 0, 1, 0], [], []>} : vector<8x4xbf16>, vector<288x4xbf16>, vector<8x288xf32> -> vector<8x288xf32>
    %28 = arith.addf %21, %27 : vector<8x288xf32>
    %c0_23 = arith.constant 0 : index
    %c19 = arith.constant 19 : index
    %c0_24 = arith.constant 0 : index
    %29 = vector.load %arg1[%c0_23, %c19, %c0_24] : memref<1x328x4xf32, #tpu.memory_space<vmem>>, vector<1x288x4xf32>
    %30 = vector.shape_cast %29 : vector<1x288x4xf32> to vector<288x4xf32>
    %31 = arith.truncf %30 : vector<288x4xf32> to vector<288x4xbf16>
    %c4 = arith.constant 4 : index
    %c0_25 = arith.constant 0 : index
    %c0_26 = arith.constant 0 : index
    %32 = vector.load %arg2[%c4, %c0_25, %c0_26] : memref<9x8x4xbf16, #tpu.memory_space<vmem>>, vector<1x8x4xbf16>
    %33 = vector.shape_cast %32 : vector<1x8x4xbf16> to vector<8x4xbf16>
    %cst_27 = arith.constant dense<0.000000e+00> : vector<8x288xf32>
    %34 = tpu.matmul %33, %31, %cst_27 {dimension_numbers = #tpu.dot_dimension_numbers<[1], [1], [0], [0], [0, 0, 1, 0], [], []>} : vector<8x4xbf16>, vector<288x4xbf16>, vector<8x288xf32> -> vector<8x288xf32>
    %35 = arith.addf %28, %34 : vector<8x288xf32>
    %c0_28 = arith.constant 0 : index
    %c20 = arith.constant 20 : index
    %c0_29 = arith.constant 0 : index
    %36 = vector.load %arg1[%c0_28, %c20, %c0_29] : memref<1x328x4xf32, #tpu.memory_space<vmem>>, vector<1x288x4xf32>
    %37 = vector.shape_cast %36 : vector<1x288x4xf32> to vector<288x4xf32>
    %38 = arith.truncf %37 : vector<288x4xf32> to vector<288x4xbf16>
    %c5 = arith.constant 5 : index
    %c0_30 = arith.constant 0 : index
    %c0_31 = arith.constant 0 : index
    %39 = vector.load %arg2[%c5, %c0_30, %c0_31] : memref<9x8x4xbf16, #tpu.memory_space<vmem>>, vector<1x8x4xbf16>
    %40 = vector.shape_cast %39 : vector<1x8x4xbf16> to vector<8x4xbf16>
    %cst_32 = arith.constant dense<0.000000e+00> : vector<8x288xf32>
    %41 = tpu.matmul %40, %38, %cst_32 {dimension_numbers = #tpu.dot_dimension_numbers<[1], [1], [0], [0], [0, 0, 1, 0], [], []>} : vector<8x4xbf16>, vector<288x4xbf16>, vector<8x288xf32> -> vector<8x288xf32>
    %42 = arith.addf %35, %41 : vector<8x288xf32>
    %c0_33 = arith.constant 0 : index
    %c36 = arith.constant 36 : index
    %c0_34 = arith.constant 0 : index
    %43 = vector.load %arg1[%c0_33, %c36, %c0_34] : memref<1x328x4xf32, #tpu.memory_space<vmem>>, vector<1x288x4xf32>
    %44 = vector.shape_cast %43 : vector<1x288x4xf32> to vector<288x4xf32>
    %45 = arith.truncf %44 : vector<288x4xf32> to vector<288x4xbf16>
    %c6 = arith.constant 6 : index
    %c0_35 = arith.constant 0 : index
    %c0_36 = arith.constant 0 : index
    %46 = vector.load %arg2[%c6, %c0_35, %c0_36] : memref<9x8x4xbf16, #tpu.memory_space<vmem>>, vector<1x8x4xbf16>
    %47 = vector.shape_cast %46 : vector<1x8x4xbf16> to vector<8x4xbf16>
    %cst_37 = arith.constant dense<0.000000e+00> : vector<8x288xf32>
    %48 = tpu.matmul %47, %45, %cst_37 {dimension_numbers = #tpu.dot_dimension_numbers<[1], [1], [0], [0], [0, 0, 1, 0], [], []>} : vector<8x4xbf16>, vector<288x4xbf16>, vector<8x288xf32> -> vector<8x288xf32>
    %49 = arith.addf %42, %48 : vector<8x288xf32>
    %c0_38 = arith.constant 0 : index
    %c37 = arith.constant 37 : index
    %c0_39 = arith.constant 0 : index
    %50 = vector.load %arg1[%c0_38, %c37, %c0_39] : memref<1x328x4xf32, #tpu.memory_space<vmem>>, vector<1x288x4xf32>
    %51 = vector.shape_cast %50 : vector<1x288x4xf32> to vector<288x4xf32>
    %52 = arith.truncf %51 : vector<288x4xf32> to vector<288x4xbf16>
    %c7 = arith.constant 7 : index
    %c0_40 = arith.constant 0 : index
    %c0_41 = arith.constant 0 : index
    %53 = vector.load %arg2[%c7, %c0_40, %c0_41] : memref<9x8x4xbf16, #tpu.memory_space<vmem>>, vector<1x8x4xbf16>
    %54 = vector.shape_cast %53 : vector<1x8x4xbf16> to vector<8x4xbf16>
    %cst_42 = arith.constant dense<0.000000e+00> : vector<8x288xf32>
    %55 = tpu.matmul %54, %52, %cst_42 {dimension_numbers = #tpu.dot_dimension_numbers<[1], [1], [0], [0], [0, 0, 1, 0], [], []>} : vector<8x4xbf16>, vector<288x4xbf16>, vector<8x288xf32> -> vector<8x288xf32>
    %56 = arith.addf %49, %55 : vector<8x288xf32>
    %c0_43 = arith.constant 0 : index
    %c38 = arith.constant 38 : index
    %c0_44 = arith.constant 0 : index
    %57 = vector.load %arg1[%c0_43, %c38, %c0_44] : memref<1x328x4xf32, #tpu.memory_space<vmem>>, vector<1x288x4xf32>
    %58 = vector.shape_cast %57 : vector<1x288x4xf32> to vector<288x4xf32>
    %59 = arith.truncf %58 : vector<288x4xf32> to vector<288x4xbf16>
    %c8 = arith.constant 8 : index
    %c0_45 = arith.constant 0 : index
    %c0_46 = arith.constant 0 : index
    %60 = vector.load %arg2[%c8, %c0_45, %c0_46] : memref<9x8x4xbf16, #tpu.memory_space<vmem>>, vector<1x8x4xbf16>
    %61 = vector.shape_cast %60 : vector<1x8x4xbf16> to vector<8x4xbf16>
    %cst_47 = arith.constant dense<0.000000e+00> : vector<8x288xf32>
    %62 = tpu.matmul %61, %59, %cst_47 {dimension_numbers = #tpu.dot_dimension_numbers<[1], [1], [0], [0], [0, 0, 1, 0], [], []>} : vector<8x4xbf16>, vector<288x4xbf16>, vector<8x288xf32> -> vector<8x288xf32>
    %63 = arith.addf %56, %62 : vector<8x288xf32>
    %c0_48 = arith.constant 0 : index
    %c0_49 = arith.constant 0 : index
    %c0_50 = arith.constant 0 : index
    %64 = vector.load %arg5[%c0_48, %c0_49, %c0_50] : memref<1x8x288xf32, #tpu.memory_space<vmem>>, vector<1x8x288xf32>
    %65 = vector.shape_cast %64 : vector<1x8x288xf32> to vector<8x288xf32>
    %66 = vector.shape_cast %63 : vector<8x288xf32> to vector<1x8x288xf32>
    tpu.vector_store %arg5[%c0_48, %c0_49, %c0_50], %66 {strides = array<i32>} : memref<1x8x288xf32, #tpu.memory_space<vmem>>, vector<1x8x288xf32>,
    %c0_51 = arith.constant 0 : index
    %c0_52 = arith.constant 0 : index
    %67 = vector.load %arg4[%c0_51, %c0_52] : memref<1x288xf32, #tpu.memory_space<vmem>>, vector<1x288xf32>
    %68 = vector.broadcast %67 : vector<1x288xf32> to vector<8x288xf32>
    %69 = arith.mulf %63, %68 : vector<8x288xf32>
    %cst_53 = arith.constant dense<0.000000e+00> : vector<8xf32>
    %70 = vector.multi_reduction <add>, %69, %cst_53 [1] : vector<8x288xf32> to vector<8xf32>
    %71 = vector.shape_cast %70 : vector<8xf32> to vector<8x1xf32>
    %c0_54 = arith.constant 0 : index
    %c0_55 = arith.constant 0 : index
    %c0_56 = arith.constant 0 : index
    %72 = vector.load %arg6[%c0_54, %c0_55, %c0_56] : memref<1x8x1xf32, #tpu.memory_space<vmem>>, vector<1x8x1xf32>
    %73 = vector.shape_cast %72 : vector<1x8x1xf32> to vector<8x1xf32>
    %74 = vector.shape_cast %71 : vector<8x1xf32> to vector<1x8x1xf32>
    tpu.vector_store %arg6[%c0_54, %c0_55, %c0_56], %74 {strides = array<i32>} : memref<1x8x1xf32, #tpu.memory_space<vmem>>, vector<1x8x1xf32>,
    %75 = arith.mulf %63, %63 : vector<8x288xf32>
    %76 = vector.broadcast %67 : vector<1x288xf32> to vector<8x288xf32>
    %77 = arith.mulf %75, %76 : vector<8x288xf32>
    %cst_57 = arith.constant dense<0.000000e+00> : vector<8xf32>
    %78 = vector.multi_reduction <add>, %77, %cst_57 [1] : vector<8x288xf32> to vector<8xf32>
    %79 = vector.shape_cast %78 : vector<8xf32> to vector<8x1xf32>
    %c0_58 = arith.constant 0 : index
    %c0_59 = arith.constant 0 : index
    %c0_60 = arith.constant 0 : index
    %80 = vector.load %arg7[%c0_58, %c0_59, %c0_60] : memref<1x8x1xf32, #tpu.memory_space<vmem>>, vector<1x8x1xf32>
    %81 = vector.shape_cast %80 : vector<1x8x1xf32> to vector<8x1xf32>
    %82 = vector.shape_cast %79 : vector<8x1xf32> to vector<1x8x1xf32>
    tpu.vector_store %arg7[%c0_58, %c0_59, %c0_60], %82 {strides = array<i32>} : memref<1x8x1xf32, #tpu.memory_space<vmem>>, vector<1x8x1xf32>,
    return
  }
  func.func @transform_0(%arg0: i32) -> (i32, i32, i32) {
    %c0_i32 = arith.constant 0 : i32
    %c0_i32_0 = arith.constant 0 : i32
    %c0_i32_1 = arith.constant 0 : i32
    return %arg0, %c0_i32, %c0_i32_0 : i32, i32, i32
  }
  func.func @transform_1(%arg0: i32) -> (i32, i32, i32) {
    %c0_i32 = arith.constant 0 : i32
    %c0_i32_0 = arith.constant 0 : i32
    %c0_i32_1 = arith.constant 0 : i32
    %c0_i32_2 = arith.constant 0 : i32
    return %c0_i32, %c0_i32_0, %c0_i32_1 : i32, i32, i32
  }
  func.func @transform_2(%arg0: i32) -> (i32, i32) {
    %c0_i32 = arith.constant 0 : i32
    %c0_i32_0 = arith.constant 0 : i32
    %c0_i32_1 = arith.constant 0 : i32
    return %c0_i32, %c0_i32_0 : i32, i32
  }
  func.func @transform_3(%arg0: i32) -> (i32, i32) {
    %c0_i32 = arith.constant 0 : i32
    %c0_i32_0 = arith.constant 0 : i32
    %c0_i32_1 = arith.constant 0 : i32
    return %c0_i32, %c0_i32_0 : i32, i32
  }
  func.func @transform_4(%arg0: i32) -> (i32, i32, i32) {
    %c0_i32 = arith.constant 0 : i32
    %c0_i32_0 = arith.constant 0 : i32
    %c0_i32_1 = arith.constant 0 : i32
    return %arg0, %c0_i32, %c0_i32_0 : i32, i32, i32
  }
  func.func @transform_5(%arg0: i32) -> (i32, i32, i32) {
    %c0_i32 = arith.constant 0 : i32
    %c0_i32_0 = arith.constant 0 : i32
    %c0_i32_1 = arith.constant 0 : i32
    return %arg0, %c0_i32, %c0_i32_0 : i32, i32, i32
  }
  func.func @transform_6(%arg0: i32) -> (i32, i32, i32) {
    %c0_i32 = arith.constant 0 : i32
    %c0_i32_0 = arith.constant 0 : i32
    %c0_i32_1 = arith.constant 0 : i32
    return %arg0, %c0_i32, %c0_i32_0 : i32, i32, i32
  }
}

</mosaic_0001>

<bundles_post_ra>
// kernel: conv_forward.3
= control target key start
LH: loop header
LB: loop body
LE: loop exit
PB: predicated region body
PF: predicated region fallthrough
CT: control target
= control target key end

     0   :  { %s300_s12 = smov 0   ;;  %s323_s0 = inlined_call_operand.vmem [shape: f32[2,8,288], index: 0, kind: input, shape index: {}]   ;;  %s324_s1 = inlined_call_operand.vmem [shape: f32[8,1], index: 1, kind: input, shape index: {}]   ;;  %s325_s2 = inlined_call_operand.vmem [shape: f32[8,1], index: 2, kind: input, shape index: {}]   ;;  %s326_s3 = inlined_call_operand.vmem [shape: f32[2,8,288], index: 3, kind: output, shape index: {}]  }
   0x1 LB: > { %s251_s13 = sadd.s32 4294967295, %s277_s12   ;;  %p255_p0 = scmp.ge.s32.totalorder %s277_s12, 1  ;;  %s277_s12 = sphi %s300_s12, %s13_s12  }
   0x2   : > { %p137_p1 = scmp.lt.s32.totalorder %s277_s12, 3 }
   0x4   : > { %p138_p2 = pnand %p255_p0, %p137_p1 }
   0x5   : > { %v174_v0 = vld [vmem:[%s324_s1] sm:$0xff] (!%p138_p2)  ;;  %v279_v1 = vmov (!%p138_p2), 0   ;;  %p161_p3 = scmp.lt.s32.totalorder (!%p138_p2), %s251_s13, 1  ;;  %vm194_vm0 = vcmask (!%p138_p2), 261120  }
   0x6   : > { %141 = sbr.rel (%p138_p2) target bundleno = 143 (0x8f), region = 32  ;;  %270 = vset.pattern.permute.xlu0 (!%p138_p2), %v279_v1  ;;  %v183_v2 = vld [vmem:[%s325_s2] sm:$0xff] (!%p138_p2) }
   0x7   : > { %177 = vperm.xlu0 (!%p138_p2), %270, %v174_v0  }
   0xb   : > { %186 = vperm.xlu0 (!%p138_p2), %270, %v183_v2  }
   0xd   : > { %s328_s13 = smov (!%p161_p3, %s251_s13), 1 }
   0xe   : > { %s260_s18 = smul.u32 24, %s328_s13 }
  0x10   : > { %s165_s21 = scalar_lea.vmem %s323_s0, %s260_s18  ;;  %s170_s24 = scalar_lea.vmem %s326_s3, %s260_s18 }
  0x11   : > { %v171_v4 = vld [vmem:[%s165_s21] sm:$0xff]  ;;  %v172_v5 = vld [vmem:[%s165_s21 + $0x8] sm:$0xff]  ;;  %v173_v6 = vld [vmem:[%s165_s21 + $0x10] sm:$0xff] }
  0x86   : > { %v178_v3 = vpop.permute.xlu0 %177 }
  0x87   : > { %v180_v7 = vmul.f32 %v178_v3, %v171_v4  ;;  %v181_v8 = vmul.f32 %v178_v3, %v172_v5  ;;  %v182_v9 = vmul.f32 %v178_v3, %v173_v6 }
  0x8a   : > { %v187_v10 = vpop.permute.xlu0 %186 }
  0x8b   : > { %v189_v11 = vadd.f32 %v187_v10, %v180_v7  ;;  %v190_v12 = vadd.f32 %v187_v10, %v181_v8  ;;  %v191_v13 = vadd.f32 %v187_v10, %v182_v9 }
  0x8d   : > { %192 = vst [vmem:[%s170_s24] sm:$0xff] %v189_v11  ;;  %193 = vst [vmem:[%s170_s24 + $0x8] sm:$0xff] %v190_v12 }
  0x8e   : > { %195 = vst.msk [vmem:[%s170_s24 + $0x10] sm:$0xff] %vm194_vm0, %v191_v13 }
  0x8f PF: > { %s13_s12 = sadd.s32 1, %s277_s12  }
  0x90   : > { %p10_p4 = scmp.ge.s32.totalorder %s13_s12, 4  }
  0x92   :  { %12 = sbr.rel (!%p10_p4) target bundleno = 1 (0x1), region = 62 }

// kernel: conv_forward.2
= control target key start
LH: loop header
LB: loop body
LE: loop exit
PB: predicated region body
PF: predicated region fallthrough
CT: control target
= control target key end

     0   :  { %s2690_s21 = smov 0   ;;  %s3354_s0 = inlined_call_operand.vmem [shape: f32[2,328,4], index: 0, kind: input, shape index: {}]   ;;  %s3355_s1 = inlined_call_operand.vmem [shape: bf16[9,8,4], index: 1, kind: input, shape index: {}]   ;;  %s3356_s2 = inlined_call_operand.vmem [shape: f32[8,1], index: 2, kind: input, shape index: {}]   ;;  %s3357_s3 = inlined_call_operand.vmem [shape: f32[1,288], index: 3, kind: input, shape index: {}]   ;;  %s3358_s4 = inlined_call_operand.vmem [shape: f32[2,8,288], index: 4, kind: output, shape index: {0}]   ;;  %s3359_s5 = inlined_call_operand.vmem [shape: f32[2,8,1], index: 5, kind: output, shape index: {1}]   ;;  %s3360_s6 = inlined_call_operand.vmem [shape: f32[2,8,1], index: 6, kind: output, shape index: {2}]  }
   0x1 LB: > { %s2201_s2 = sadd.s32 4294967295, %s2651_s21   ;;  %p2205_p0 = scmp.ge.s32.totalorder %s2651_s21, 1  ;;  %s2651_s21 = sphi %s2690_s21, %s17_s21  }
   0x2   : > { %p217_p1 = scmp.lt.s32.totalorder %s2651_s21, 3 }
   0x4   : > { %p218_p2 = pnand %p2205_p0, %p217_p1 }
   0x5   : > { %p255_p3 = scmp.lt.s32.totalorder (!%p218_p2), %s2201_s2, 1  ;;  %vm385_vm0 = vcmask (!%p218_p2), 31744   ;;  %v2701_v0 = vld [vmem:[%s3355_s1 + $0x4] sm:$0xf] (!%p218_p2)  ;;  %v2708_v1 = vld [vmem:[%s3355_s1 + $0xc] sm:$0xf] (!%p218_p2) }
   0x6   : > { %221 = sbr.rel (%p218_p2) target bundleno = 775 (0x307), region = 36  ;;  %2254 = vmatprep.mubr.msk.bf16.mxu1 (!%p218_p2), %vm385_vm0, %v2701_v0  ;;  %2317 = vmatprep.mubr.msk.bf16.mxu0 (!%p218_p2), %vm385_vm0, %v2708_v1  ;;  %vm2654_vm1 = vmmov (!%p218_p2), 0   ;;  %vm2043_vm2 = vcmask (!%p218_p2), 261120   ;;  %vm2070_vm3 = vcmask (!%p218_p2), 7168  }
   0xd   : > { %s3362_s2 = smov (!%p255_p3, %s2201_s2), 1 }
   0xe   : > { %s2633_s26 = smul.u32 328, %s3362_s2  ;;  %s2208_s27 = sshll.u32 %s3362_s2, 3 }
   0xf   : > { %s2634_s20 = smul.u32 24, %s3362_s2  ;;  %s268_s30 = scalar_lea.vmem %s3359_s5, %s2208_s27 }
  0x10   : > { %s2718_s29 = scalar_lea.vmem %s3354_s0, %s2633_s26  ;;  %s272_s9 = scalar_lea.vmem %s3360_s6, %s2208_s27 }
  0x11   : > { %v345_v2 = vld [vmem:[%s2718_s29 + $0x81] sm:$0xff]  ;;  %v346_v3 = vld [vmem:[%s2718_s29 + $0x89] sm:$0xff]  ;;  %v875_v4 = vld [vmem:[%s2718_s29 + $0x92] sm:$0xff]  ;;  %s264_s24 = scalar_lea.vmem %s3358_s4, %s2634_s20 }
  0x12   : > { %v373_v5 = vpack.c.bf16 %v346_v3, %v345_v2  ;;  %v876_v6 = vld [vmem:[%s2718_s29 + $0x9a] sm:$0xff]  ;;  %v330_v8 = vld [vmem:[%s2718_s29 + $0x9] sm:$0xff]  ;;  %v859_v11 = vld [vmem:[%s2718_s29 + $0x12] sm:$0xff] }
  0x13   : > { %v329_v7 = vld [vmem:[%s2718_s29 + $0x1] sm:$0xff]  ;;  %v2726_v9 = vpack.c.bf16 %v876_v6, %v875_v4  ;;  %v347_v13 = vld [vmem:[%s2718_s29 + $0x91] sm:$0xff]  ;;  %v348_v15 = vld [vmem:[%s2718_s29 + $0x99] sm:$0xff] }
  0x14   : > { %v365_v10 = vpack.c.bf16 %v330_v8, %v329_v7  ;;  %v860_v12 = vld [vmem:[%s2718_s29 + $0x1a] sm:$0xff]  ;;  %2561 = vmatprep.subr.msk.bf16.mxu1 %vm385_vm0, %v373_v5  ;;  %v877_v16 = vld [vmem:[%s2718_s29 + $0xa2] sm:$0xff]  ;;  %v878_v17 = vld [vmem:[%s2718_s29 + $0xaa] sm:$0xff]  ;;  %v374_v19 = vpack.c.bf16 %v348_v15, %v347_v13 }
  0x15   : > { %v895_v14 = vpack.c.bf16 %v860_v12, %v859_v11  ;;  %2585 = vmatprep.subr.msk.bf16.mxu0 %vm385_vm0, %v2726_v9  ;;  %v2738_v20 = vpack.c.bf16 %v878_v17, %v877_v16  ;;  %v331_v21 = vld [vmem:[%s2718_s29 + $0x11] sm:$0xff]  ;;  %v332_v22 = vld [vmem:[%s2718_s29 + $0x19] sm:$0xff]  ;;  %v861_v23 = vld [vmem:[%s2718_s29 + $0x22] sm:$0xff] }
  0x16   : > { %v390_v18 = vsel %vm385_vm0, %v365_v10, 0  ;;  %v862_v25 = vld [vmem:[%s2718_s29 + $0x2a] sm:$0xff]  ;;  %v366_v26 = vpack.c.bf16 %v332_v22, %v331_v21  ;;  %v349_v28 = vld [vmem:[%s2718_s29 + $0xa1] sm:$0xff]  ;;  %v879_v30 = vld [vmem:[%s2718_s29 + $0xb2] sm:$0xff] }
  0x17   : > { %2239 = vmatpush3.bf16.xpose.msra.mxu1 %v390_v18  ;;  %v2744_v24 = vsel %vm385_vm0, %v895_v14, 0  ;;  %v896_v27 = vpack.c.bf16 %v862_v25, %v861_v23  ;;  %v350_v29 = vld [vmem:[%s2718_s29 + $0xa9] sm:$0xff]  ;;  %v880_v31 = vld [vmem:[%s2718_s29 + $0xba] sm:$0xff]  ;;  %v863_v38 = vld [vmem:[%s2718_s29 + $0x32] sm:$0xff] }
  0x18   : > { %2302 = vmatpush3.bf16.xpose.msra.mxu0 %v2744_v24  ;;  %2562 = vmatprep.subr.msk.bf16.mxu1 %vm385_vm0, %v374_v19  ;;  %v393_v32 = vsel %vm385_vm0, %v366_v26, 0  ;;  %v375_v33 = vpack.c.bf16 %v350_v29, %v349_v28  ;;  %v2759_v35 = vpack.c.bf16 %v880_v31, %v879_v30  ;;  %v333_v36 = vld [vmem:[%s2718_s29 + $0x21] sm:$0xff]  ;;  %v334_v37 = vld [vmem:[%s2718_s29 + $0x29] sm:$0xff]  ;;  %v351_v42 = vld [vmem:[%s2718_s29 + $0xb1] sm:$0xff] }
  0x19   : > { %2586 = vmatprep.subr.msk.bf16.mxu0 %vm385_vm0, %v2738_v20  ;;  %v2757_v34 = vsel %vm385_vm0, %v896_v27, 0  ;;  %v864_v39 = vld [vmem:[%s2718_s29 + $0x3a] sm:$0xff]  ;;  %v367_v40 = vpack.c.bf16 %v334_v37, %v333_v36  ;;  %v881_v44 = vld [vmem:[%s2718_s29 + $0xc2] sm:$0xff]  ;;  %v882_v45 = vld [vmem:[%s2718_s29 + $0xca] sm:$0xff] }
  0x1a   : > { %v897_v41 = vpack.c.bf16 %v864_v39, %v863_v38  ;;  %v352_v43 = vld [vmem:[%s2718_s29 + $0xb9] sm:$0xff]  ;;  %v2777_v49 = vpack.c.bf16 %v882_v45, %v881_v44  ;;  %v335_v50 = vld [vmem:[%s2718_s29 + $0x31] sm:$0xff]  ;;  %v865_v52 = vld [vmem:[%s2718_s29 + $0x42] sm:$0xff] }
  0x1b   : > { %v396_v46 = vsel %vm385_vm0, %v367_v40, 0  ;;  %v376_v47 = vpack.c.bf16 %v352_v43, %v351_v42  ;;  %v336_v51 = vld [vmem:[%s2718_s29 + $0x39] sm:$0xff]  ;;  %v866_v53 = vld [vmem:[%s2718_s29 + $0x4a] sm:$0xff]  ;;  %v353_v56 = vld [vmem:[%s2718_s29 + $0xc1] sm:$0xff] }
  0x1c   : > { %v2775_v48 = vsel %vm385_vm0, %v897_v41, 0  ;;  %v368_v54 = vpack.c.bf16 %v336_v51, %v335_v50  ;;  %v898_v55 = vpack.c.bf16 %v866_v53, %v865_v52  ;;  %v354_v57 = vld [vmem:[%s2718_s29 + $0xc9] sm:$0xff]  ;;  %v883_v58 = vld [vmem:[%s2718_s29 + $0xd2] sm:$0xff]  ;;  %v884_v59 = vld [vmem:[%s2718_s29 + $0xda] sm:$0xff] }
  0x1d   : > { %v377_v61 = vpack.c.bf16 %v354_v57, %v353_v56  ;;  %v2795_v63 = vpack.c.bf16 %v884_v59, %v883_v58  ;;  %v337_v2 = vld [vmem:[%s2718_s29 + $0x41] sm:$0xff]  ;;  %v338_v3 = vld [vmem:[%s2718_s29 + $0x49] sm:$0xff]  ;;  %v867_v4 = vld [vmem:[%s2718_s29 + $0x52] sm:$0xff] }
  0x1e   : > { %v399_v60 = vsel %vm385_vm0, %v368_v54, 0  ;;  %v2793_v62 = vsel %vm385_vm0, %v898_v55, 0  ;;  %v868_v5 = vld [vmem:[%s2718_s29 + $0x5a] sm:$0xff]  ;;  %v369_v6 = vpack.c.bf16 %v338_v3, %v337_v2  ;;  %v355_v8 = vld [vmem:[%s2718_s29 + $0xd1] sm:$0xff]  ;;  %v885_v11 = vld [vmem:[%s2718_s29 + $0xe2] sm:$0xff] }
  0x1f   : > { %2241 = vmatpush3.bf16.xpose.msra.mxu1 %v393_v32  ;;  %v899_v7 = vpack.c.bf16 %v868_v5, %v867_v4  ;;  %v356_v10 = vld [vmem:[%s2718_s29 + $0xd9] sm:$0xff]  ;;  %v886_v12 = vld [vmem:[%s2718_s29 + $0xea] sm:$0xff]  ;;  %v869_v19 = vld [vmem:[%s2718_s29 + $0x62] sm:$0xff] }
  0x20   : > { %2304 = vmatpush3.bf16.xpose.msra.mxu0 %v2757_v34  ;;  %2563 = vmatprep.subr.msk.bf16.mxu1 %vm385_vm0, %v375_v33  ;;  %v402_v13 = vsel %vm385_vm0, %v369_v6, 0  ;;  %v378_v14 = vpack.c.bf16 %v356_v10, %v355_v8  ;;  %v2813_v16 = vpack.c.bf16 %v886_v12, %v885_v11  ;;  %v339_v17 = vld [vmem:[%s2718_s29 + $0x51] sm:$0xff]  ;;  %v340_v18 = vld [vmem:[%s2718_s29 + $0x59] sm:$0xff]  ;;  %v357_v25 = vld [vmem:[%s2718_s29 + $0xe1] sm:$0xff]  ;;  %v2653_v6 = vmov 0.0  }
  0x21   : > { %2587 = vmatprep.subr.msk.bf16.mxu0 %vm385_vm0, %v2759_v35  ;;  %v2811_v15 = vsel %vm385_vm0, %v899_v7, 0  ;;  %v870_v21 = vld [vmem:[%s2718_s29 + $0x6a] sm:$0xff]  ;;  %v370_v22 = vpack.c.bf16 %v340_v18, %v339_v17  ;;  %v887_v27 = vld [vmem:[%s2718_s29 + $0xf2] sm:$0xff]  ;;  %v888_v28 = vld [vmem:[%s2718_s29 + $0xfa] sm:$0xff] }
  0x22   : > { %v900_v23 = vpack.c.bf16 %v870_v21, %v869_v19  ;;  %v358_v26 = vld [vmem:[%s2718_s29 + $0xe9] sm:$0xff]  ;;  %v2831_v32 = vpack.c.bf16 %v888_v28, %v887_v27  ;;  %v341_v33 = vld [vmem:[%s2718_s29 + $0x61] sm:$0xff]  ;;  %v871_v37 = vld [vmem:[%s2718_s29 + $0x72] sm:$0xff] }
  0x23   : > { %v405_v29 = vsel %vm385_vm0, %v370_v22, 0  ;;  %v379_v30 = vpack.c.bf16 %v358_v26, %v357_v25  ;;  %v342_v36 = vld [vmem:[%s2718_s29 + $0x69] sm:$0xff]  ;;  %v872_v38 = vld [vmem:[%s2718_s29 + $0x7a] sm:$0xff]  ;;  %v359_v41 = vld [vmem:[%s2718_s29 + $0xf1] sm:$0xff] }
  0x24   : > { %v2829_v31 = vsel %vm385_vm0, %v900_v23, 0  ;;  %v371_v39 = vpack.c.bf16 %v342_v36, %v341_v33  ;;  %v901_v40 = vpack.c.bf16 %v872_v38, %v871_v37  ;;  %v360_v42 = vld [vmem:[%s2718_s29 + $0xf9] sm:$0xff]  ;;  %v889_v43 = vld [vmem:[%s2718_s29 + $0x102] sm:$0xff]  ;;  %v890_v44 = vld [vmem:[%s2718_s29 + $0x10a] sm:$0xff] }
  0x25   : > { %v2849_v50 = vpack.c.bf16 %v890_v44, %v889_v43  ;;  %v343_v51 = vld [vmem:[%s2718_s29 + $0x71] sm:$0xff]  ;;  %v344_v52 = vld [vmem:[%s2718_s29 + $0x79] sm:$0xff]  ;;  %v873_v53 = vld [vmem:[%s2718_s29 + $0x82] sm:$0xff] }
  0x26   : > { %v408_v45 = vsel %vm385_vm0, %v371_v39, 0  ;;  %v874_v54 = vld [vmem:[%s2718_s29 + $0x8a] sm:$0xff]  ;;  %v372_v55 = vpack.c.bf16 %v344_v52, %v343_v51  ;;  %v1072_v57 = vld [vmem:[%s2718_s29 + $0x93] sm:$0xff]  ;;  %v1073_v58 = vld [vmem:[%s2718_s29 + $0x9b] sm:$0xff] }
  0x27   : > { %2243 = vmatpush3.bf16.xpose.msra.mxu1 %v396_v46  ;;  %v380_v46 = vpack.c.bf16 %v360_v42, %v359_v41  ;;  %v2859_v56 = vpack.c.bf16 %v874_v54, %v873_v53  ;;  %v361_v2 = vld [vmem:[%s2718_s29 + $0x101] sm:$0xff]  ;;  %v362_v3 = vld [vmem:[%s2718_s29 + $0x109] sm:$0xff]  ;;  %v1056_v4 = vld [vmem:[%s2718_s29 + $0x13] sm:$0xff] }
  0x28   : > { %2306 = vmatpush3.bf16.xpose.msra.mxu0 %v2775_v48  ;;  %2564 = vmatprep.subr.msk.bf16.mxu1 %vm385_vm0, %v376_v47  ;;  %v2847_v47 = vsel %vm385_vm0, %v901_v40, 0  ;;  %v411_v59 = vsel %vm385_vm0, %v372_v55, 0  ;;  %v1057_v5 = vld [vmem:[%s2718_s29 + $0x1b] sm:$0xff]  ;;  %v381_v7 = vpack.c.bf16 %v362_v3, %v361_v2  ;;  %v1074_v10 = vld [vmem:[%s2718_s29 + $0xa3] sm:$0xff]  ;;  %v1075_v11 = vld [vmem:[%s2718_s29 + $0xab] sm:$0xff] }
  0x29   : > { %2588 = vmatprep.subr.msk.bf16.mxu0 %vm385_vm0, %v2777_v49  ;;  %v1092_v8 = vpack.c.bf16 %v1057_v5, %v1056_v4  ;;  %v363_v17 = vld [vmem:[%s2718_s29 + $0x111] sm:$0xff]  ;;  %v364_v18 = vld [vmem:[%s2718_s29 + $0x119] sm:$0xff]  ;;  %v1058_v19 = vld [vmem:[%s2718_s29 + $0x23] sm:$0xff] }
  0x2a   : > { %v438_v12 = vsel %vm385_vm0, %v381_v7, 0  ;;  %v1059_v21 = vld [vmem:[%s2718_s29 + $0x2b] sm:$0xff]  ;;  %v382_v23 = vpack.c.bf16 %v364_v18, %v363_v17  ;;  %v290_v26 = vld [vmem:[%s2718_s29 + $0x80] sm:$0xff]  ;;  %v1076_v28 = vld [vmem:[%s2718_s29 + $0xb3] sm:$0xff] }
  0x2b   : > { %v2887_v22 = vld [vmem:[%s3355_s1 + $0x10] sm:$0xf]  ;;  %v1093_v25 = vpack.c.bf16 %v1059_v21, %v1058_v19  ;;  %v291_v27 = vld [vmem:[%s2718_s29 + $0x88] sm:$0xff]  ;;  %v274_v38 = vld [vmem:[%s2718_s29] sm:$0xff] }
  0x2c   : > { %v318_v33 = vpack.c.bf16 %v291_v27, %v290_v26  ;;  %v275_v39 = vld [vmem:[%s2718_s29 + $0x8] sm:$0xff]  ;;  %v1060_v40 = vld [vmem:[%s2718_s29 + $0x33] sm:$0xff]  ;;  %v1061_v41 = vld [vmem:[%s2718_s29 + $0x3b] sm:$0xff] }
  0x2d   : > { %v1119_v36 = vsel %vm385_vm0, %v1093_v25, 0  ;;  %v310_v42 = vpack.c.bf16 %v275_v39, %v274_v38  ;;  %v1094_v43 = vpack.c.bf16 %v1061_v41, %v1060_v40  ;;  %v292_v44 = vld [vmem:[%s2718_s29 + $0x90] sm:$0xff]  ;;  %v2915_v54 = vld [vmem:[%s3355_s1] sm:$0xf]  ;;  %v295_v5 = vld [vmem:[%s2718_s29 + $0xa8] sm:$0xff] }
  0x2e   : > { %v1079_v51 = vld [vmem:[%s2718_s29 + $0xcb] sm:$0xff]  ;;  %v294_v4 = vld [vmem:[%s2718_s29 + $0xa0] sm:$0xff]  ;;  %v1064_v17 = vld [vmem:[%s2718_s29 + $0x53] sm:$0xff] }
  0x2f   : > { %2245 = vmatpush3.bf16.xpose.msra.mxu1 %v399_v60  ;;  %v940_v60 = vsel %vm385_vm0, %v2859_v56, 0  ;;  %v528_v52 = vsel %vm385_vm0, %v310_v42, 0  ;;  %v1122_v55 = vsel %vm385_vm0, %v1094_v43, 0  ;;  %v1081_v7 = vld [vmem:[%s2718_s29 + $0xdb] sm:$0xff]  ;;  %v1082_v26 = vld [vmem:[%s2718_s29 + $0xe3] sm:$0xff]  ;;  %v1083_v27 = vld [vmem:[%s2718_s29 + $0xeb] sm:$0xff] }
  0x30   : > { %2308 = vmatpush3.bf16.xpose.msra.mxu0 %v2793_v62  ;;  %2565 = vmatprep.subr.msk.bf16.mxu1 %vm385_vm0, %v377_v61  ;;  %v1100_v61 = vpack.c.bf16 %v1073_v58, %v1072_v57  ;;  %v276_v58 = vld [vmem:[%s2718_s29 + $0x10] sm:$0xff]  ;;  %v1065_v18 = vld [vmem:[%s2718_s29 + $0x5b] sm:$0xff]  ;;  %v1066_v38 = vld [vmem:[%s2718_s29 + $0x63] sm:$0xff] }
  0x31   : > { %2589 = vmatprep.subr.msk.bf16.mxu0 %vm385_vm0, %v2795_v63  ;;  %v1096_v21 = vpack.c.bf16 %v1065_v18, %v1064_v17  ;;  %v297_v25 = vld [vmem:[%s2718_s29 + $0xb8] sm:$0xff]  ;;  %v1067_v39 = vld [vmem:[%s2718_s29 + $0x6b] sm:$0xff]  ;;  %v298_v42 = vld [vmem:[%s2718_s29 + $0xc0] sm:$0xff] }
  0x32   : > { %v1097_v41 = vpack.c.bf16 %v1067_v39, %v1066_v38  ;;  %v299_v43 = vld [vmem:[%s2718_s29 + $0xc8] sm:$0xff] }
  0x37   : > { %2247 = vmatpush3.bf16.xpose.msra.mxu1 %v402_v13  ;;  %v1116_v13 = vsel %vm385_vm0, %v1092_v8, 0 }
  0x38   : > { %2310 = vmatpush3.bf16.xpose.msra.mxu0 %v2811_v15  ;;  %2566 = vmatprep.subr.msk.bf16.mxu1 %vm385_vm0, %v378_v14  ;;  %v1101_v14 = vpack.c.bf16 %v1075_v11, %v1074_v10  ;;  %v320_v10 = vpack.c.bf16 %v295_v5, %v294_v4  ;;  %v1086_v4 = vld [vmem:[%s2718_s29 + $0x103] sm:$0xff]  ;;  %v1087_v5 = vld [vmem:[%s2718_s29 + $0x10b] sm:$0xff] }
  0x39   : > { %2590 = vmatprep.subr.msk.bf16.mxu0 %vm385_vm0, %v2813_v16 }
  0x3f   : > { %2249 = vmatpush3.bf16.xpose.msra.mxu1 %v405_v29  ;;  %v1077_v29 = vld [vmem:[%s2718_s29 + $0xbb] sm:$0xff] }
  0x40   : > { %2312 = vmatpush3.bf16.xpose.msra.mxu0 %v2829_v31  ;;  %2567 = vmatprep.subr.msk.bf16.mxu1 %vm385_vm0, %v379_v30  ;;  %v441_v30 = vsel %vm385_vm0, %v382_v23, 0  ;;  %v1102_v37 = vpack.c.bf16 %v1077_v29, %v1076_v28  ;;  %v296_v23 = vld [vmem:[%s2718_s29 + $0xb0] sm:$0xff] }
  0x41   : > { %2591 = vmatprep.subr.msk.bf16.mxu0 %vm385_vm0, %v2831_v32  ;;  %v321_v29 = vpack.c.bf16 %v297_v25, %v296_v23  ;;  %v1269_v23 = vld [vmem:[%s2718_s29 + $0x94] sm:$0xff]  ;;  %v1270_v25 = vld [vmem:[%s2718_s29 + $0x9c] sm:$0xff] }
  0x47   : > { %2251 = vmatpush3.bf16.xpose.msra.mxu1 %v408_v45  ;;  %v293_v45 = vld [vmem:[%s2718_s29 + $0x98] sm:$0xff] }
  0x48   : > { %2314 = vmatpush3.bf16.xpose.msra.mxu0 %v2847_v47  ;;  %2568 = vmatprep.subr.msk.bf16.mxu1 %vm385_vm0, %v380_v46  ;;  %v1078_v46 = vld [vmem:[%s2718_s29 + $0xc3] sm:$0xff]  ;;  %v319_v53 = vpack.c.bf16 %v293_v45, %v292_v44  ;;  %v1084_v44 = vld [vmem:[%s2718_s29 + $0xf3] sm:$0xff]  ;;  %v1085_v45 = vld [vmem:[%s2718_s29 + $0xfb] sm:$0xff] }
  0x49   : > { %2592 = vmatprep.subr.msk.bf16.mxu0 %vm385_vm0, %v2849_v50  ;;  %v1103_v57 = vpack.c.bf16 %v1079_v51, %v1078_v46  ;;  %v322_v51 = vpack.c.bf16 %v299_v43, %v298_v42  ;;  %v1271_v42 = vld [vmem:[%s2718_s29 + $0xa4] sm:$0xff]  ;;  %v1272_v43 = vld [vmem:[%s2718_s29 + $0xac] sm:$0xff] }
  0x4f   : > { %2253 = vmatpush3.bf16.xpose.msra.mxu1 %v411_v59  ;;  %v277_v59 = vld [vmem:[%s2718_s29 + $0x18] sm:$0xff] }
  0x50   : > { %2316 = vmatpush3.bf16.xpose.msra.mxu0 %v940_v60  ;;  %2427 = vmatprep.subr.bf16.mxu1 %v2653_v6  ;;  %v1062_v60 = vld [vmem:[%s2718_s29 + $0x43] sm:$0xff]  ;;  %v311_v2 = vpack.c.bf16 %v277_v59, %v276_v58  ;;  %v1068_v58 = vld [vmem:[%s2718_s29 + $0x73] sm:$0xff]  ;;  %v1069_v59 = vld [vmem:[%s2718_s29 + $0x7b] sm:$0xff] }
  0x51   : > { %2593 = vmatprep.subr.msk.bf16.mxu0 %vm385_vm0, %v1100_v61  ;;  %v1063_v61 = vld [vmem:[%s2718_s29 + $0x4b] sm:$0xff] }
  0x52   : > { %v1095_v3 = vpack.c.bf16 %v1063_v61, %v1062_v60  ;;  %v531_v8 = vsel %vm385_vm0, %v311_v2, 0  ;;  %v1098_v61 = vpack.c.bf16 %v1069_v59, %v1068_v58  ;;  %v300_v2 = vld [vmem:[%s2718_s29 + $0xd0] sm:$0xff] }
  0x53   : > { %v3006_v58 = vld [vmem:[%s3355_s1 + $0x14] sm:$0xf] }
  0x54   : > { %v1125_v11 = vsel %vm385_vm0, %v1095_v3, 0  ;;  %v301_v3 = vld [vmem:[%s2718_s29 + $0xd8] sm:$0xff] }
  0x56   : > { %2255 = vmatmul.mubr.msk.bf16.vlgmr.msra.gmra.mrb[0].mxu1 %vm385_vm0, %v2701_v0 }
  0x57   : > { %2428 = vmatpush3.bf16.xpose.msra.mxu1 %v438_v12  ;;  %2318 = vmatmul.mubr.msk.bf16.vlgmr.msra.gmra.mrb[0].mxu0 %vm385_vm0, %v2708_v1 }
  0x58   : > { %2323 = vmatpush3.bf16.xpose.msra.mxu0 %v1116_v13  ;;  %2429 = vmatprep.subr.bf16.mxu1 %v2653_v6  ;;  %v278_v13 = vld [vmem:[%s2718_s29 + $0x20] sm:$0xff] }
  0x59   : > { %2594 = vmatprep.subr.msk.bf16.mxu0 %vm385_vm0, %v1101_v14  ;;  %2431 = vmatprep.mubr.msk.bf16.mxu1 %vm2654_vm1, %v2653_v6  ;;  %v279_v14 = vld [vmem:[%s2718_s29 + $0x28] sm:$0xff] }
  0x5a   : > { %2338 = vmatprep.mubr.msk.bf16.mxu0 %vm385_vm0, %v2887_v22  ;;  %v312_v19 = vpack.c.bf16 %v279_v14, %v278_v13  ;;  %v1070_v13 = vld [vmem:[%s2718_s29 + $0x83] sm:$0xff]  ;;  %v1071_v14 = vld [vmem:[%s2718_s29 + $0x8b] sm:$0xff] }
  0x5b   : > { %v1099_v18 = vpack.c.bf16 %v1071_v14, %v1070_v13  ;;  %v1275_v13 = vld [vmem:[%s2718_s29 + $0xc4] sm:$0xff]  ;;  %v1276_v14 = vld [vmem:[%s2718_s29 + $0xcc] sm:$0xff] }
  0x5c   : > { %v534_v28 = vsel %vm385_vm0, %v312_v19, 0  ;;  %v302_v19 = vld [vmem:[%s2718_s29 + $0xe0] sm:$0xff] }
  0x5f   : > { %2430 = vmatpush3.bf16.xpose.msra.mxu1 %v441_v30  ;;  %v1128_v30 = vsel %vm385_vm0, %v1096_v21, 0  ;;  %v303_v21 = vld [vmem:[%s2718_s29 + $0xe8] sm:$0xff] }
  0x60   : > { %2325 = vmatpush3.bf16.xpose.msra.mxu0 %v1119_v36  ;;  %2569 = vmatprep.subr.msk.bf16.mxu1 %vm385_vm0, %v318_v33  ;;  %v1105_v33 = vpack.c.bf16 %v1083_v27, %v1082_v26  ;;  %v280_v36 = vld [vmem:[%s2718_s29 + $0x30] sm:$0xff]  ;;  %v324_v27 = vpack.c.bf16 %v303_v21, %v302_v19  ;;  %v3037_v19 = vpack.c.bf16 %v1276_v14, %v1275_v13  ;;  %v1267_v13 = vld [vmem:[%s2718_s29 + $0x84] sm:$0xff] }
  0x61   : > { %2595 = vmatprep.subr.msk.bf16.mxu0 %vm385_vm0, %v1102_v37  ;;  %v281_v37 = vld [vmem:[%s2718_s29 + $0x38] sm:$0xff]  ;;  %v308_v21 = vld [vmem:[%s2718_s29 + $0x110] sm:$0xff] }
  0x62   : > { %v313_v40 = vpack.c.bf16 %v281_v37, %v280_v36  ;;  %v1253_v36 = vld [vmem:[%s2718_s29 + $0x14] sm:$0xff]  ;;  %v1254_v37 = vld [vmem:[%s2718_s29 + $0x1c] sm:$0xff]  ;;  %v1268_v14 = vld [vmem:[%s2718_s29 + $0x8c] sm:$0xff] }
  0x63   : > { %v1289_v39 = vpack.c.bf16 %v1254_v37, %v1253_v36 }
  0x64   : > { %v537_v46 = vsel %vm385_vm0, %v313_v40, 0  ;;  %v304_v40 = vld [vmem:[%s2718_s29 + $0xf0] sm:$0xff] }
  0x66   : > { %2432 = vmatmul.mubr.msk.bf16.vlgmr.msra.gmra.mrb[4].mxu1 %vm385_vm0, %v2701_v0  ;;  %v1080_v0 = vld [vmem:[%s2718_s29 + $0xd3] sm:$0xff] }
  0x67   : > { %2260 = vmatpush3.bf16.xpose.msra.mxu1 %v528_v52  ;;  %2275 = vmatprep.mubr.msk.bf16.mxu1 %vm385_vm0, %v2915_v54  ;;  %v1104_v12 = vpack.c.bf16 %v1081_v7, %v1080_v0  ;;  %v1131_v52 = vsel %vm385_vm0, %v1097_v41, 0  ;;  %v323_v7 = vpack.c.bf16 %v301_v3, %v300_v2  ;;  %v305_v41 = vld [vmem:[%s2718_s29 + $0xf8] sm:$0xff] }
  0x68   : > { %2327 = vmatpush3.bf16.xpose.msra.mxu0 %v1122_v55  ;;  %2570 = vmatprep.subr.msk.bf16.mxu1 %vm385_vm0, %v319_v53  ;;  %v1106_v53 = vpack.c.bf16 %v1085_v45, %v1084_v44  ;;  %v282_v55 = vld [vmem:[%s2718_s29 + $0x40] sm:$0xff]  ;;  %v325_v45 = vpack.c.bf16 %v305_v41, %v304_v40  ;;  %v663_v40 = vld [vmem:[%s2718_s29 + $0xa] sm:$0xff]  ;;  %v1261_v41 = vld [vmem:[%s2718_s29 + $0x54] sm:$0xff] }
  0x69   : > { %2596 = vmatprep.subr.msk.bf16.mxu0 %vm385_vm0, %v1103_v57  ;;  %v283_v57 = vld [vmem:[%s2718_s29 + $0x48] sm:$0xff]  ;;  %v1274_v2 = vld [vmem:[%s2718_s29 + $0xbc] sm:$0xff] }
  0x6a   : > { %v314_v60 = vpack.c.bf16 %v283_v57, %v282_v55  ;;  %v1255_v55 = vld [vmem:[%s2718_s29 + $0x24] sm:$0xff]  ;;  %v1256_v57 = vld [vmem:[%s2718_s29 + $0x2c] sm:$0xff] }
  0x6c   : > { %v540_v0 = vsel %vm385_vm0, %v314_v60, 0  ;;  %v1290_v60 = vpack.c.bf16 %v1256_v57, %v1255_v55  ;;  %v1263_v57 = vld [vmem:[%s2718_s29 + $0x64] sm:$0xff] }
  0x6f   : > { %2262 = vmatpush3.bf16.xpose.msra.mxu1 %v531_v8  ;;  %v1134_v8 = vsel %vm385_vm0, %v1098_v61, 0  ;;  %v1273_v61 = vld [vmem:[%s2718_s29 + $0xb4] sm:$0xff] }
  0x70   : > { %2329 = vmatpush3.bf16.xpose.msra.mxu0 %v1125_v11  ;;  %2571 = vmatprep.subr.msk.bf16.mxu1 %vm385_vm0, %v320_v10  ;;  %v1107_v10 = vpack.c.bf16 %v1087_v5, %v1086_v4  ;;  %v284_v11 = vld [vmem:[%s2718_s29 + $0x50] sm:$0xff]  ;;  %v3019_v4 = vsel %vm385_vm0, %v1290_v60, 0  ;;  %v3021_v5 = vpack.c.bf16 %v1274_v2, %v1273_v61  ;;  %v1282_v2 = vld [vmem:[%s2718_s29 + $0xfc] sm:$0xff] }
  0x71   : > { %2597 = vmatprep.subr.msk.bf16.mxu0 %vm385_vm0, %v1104_v12  ;;  %v285_v12 = vld [vmem:[%s2718_s29 + $0x58] sm:$0xff] }
  0x72   : > { %v315_v17 = vpack.c.bf16 %v285_v12, %v284_v11  ;;  %v1281_v61 = vld [vmem:[%s2718_s29 + $0xf4] sm:$0xff] }
  0x74   : > { %v543_v26 = vsel %vm385_vm0, %v315_v17, 0 }
  0x77   : > { %2264 = vmatpush3.bf16.xpose.msra.mxu1 %v534_v28  ;;  %v1137_v28 = vsel %vm385_vm0, %v1099_v18, 0 }
  0x78   : > { %2331 = vmatpush3.bf16.xpose.msra.mxu0 %v1128_v30  ;;  %2572 = vmatprep.subr.msk.bf16.mxu1 %vm385_vm0, %v321_v29  ;;  %v2982_v29 = vpack.c.bf16 %v1270_v25, %v1269_v23  ;;  %v286_v30 = vld [vmem:[%s2718_s29 + $0x60] sm:$0xff]  ;;  %v309_v23 = vld [vmem:[%s2718_s29 + $0x118] sm:$0xff] }
  0x79   : > { %2598 = vmatprep.subr.msk.bf16.mxu0 %vm385_vm0, %v1105_v33  ;;  %v287_v33 = vld [vmem:[%s2718_s29 + $0x68] sm:$0xff] }
  0x7a   : > { %v316_v38 = vpack.c.bf16 %v287_v33, %v286_v30  ;;  %v1259_v25 = vld [vmem:[%s2718_s29 + $0x44] sm:$0xff]  ;;  %v1277_v30 = vld [vmem:[%s2718_s29 + $0xd4] sm:$0xff]  ;;  %v1278_v33 = vld [vmem:[%s2718_s29 + $0xdc] sm:$0xff] }
  0x7c   : > { %v546_v44 = vsel %vm385_vm0, %v316_v38, 0  ;;  %v3057_v38 = vpack.c.bf16 %v1278_v33, %v1277_v30  ;;  %v1666_v30 = vld [vmem:[%s2718_s29 + $0xbd] sm:$0xff] }
  0x7f   : > { %2266 = vmatpush3.bf16.xpose.msra.mxu1 %v537_v46  ;;  %v1313_v46 = vsel %vm385_vm0, %v1289_v39, 0  ;;  %v662_v39 = vld [vmem:[%s2718_s29 + $0x2] sm:$0xff] }
  0x80   : > { %2333 = vmatpush3.bf16.xpose.msra.mxu0 %v1131_v52  ;;  %2573 = vmatprep.subr.msk.bf16.mxu1 %vm385_vm0, %v322_v51  ;;  %v2997_v51 = vpack.c.bf16 %v1272_v43, %v1271_v42  ;;  %v288_v52 = vld [vmem:[%s2718_s29 + $0x70] sm:$0xff]  ;;  %v1262_v42 = vld [vmem:[%s2718_s29 + $0x5c] sm:$0xff]  ;;  %v698_v43 = vpack.c.bf16 %v663_v40, %v662_v39 }
  0x81   : > { %2599 = vmatprep.subr.msk.bf16.mxu0 %vm385_vm0, %v1106_v53  ;;  %v289_v53 = vld [vmem:[%s2718_s29 + $0x78] sm:$0xff] }
  0x82   : > { %v317_v59 = vpack.c.bf16 %v289_v53, %v288_v52  ;;  %v722_v52 = vsel %vm385_vm0, %v698_v43, 0  ;;  %v3074_v53 = vld [vmem:[%s3355_s1 + $0x8] sm:$0xf]  ;;  %v1649_v39 = vld [vmem:[%s2718_s29 + $0x35] sm:$0xff]  ;;  %v1650_v40 = vld [vmem:[%s2718_s29 + $0x3d] sm:$0xff] }
  0x83   : > { %v1667_v43 = vld [vmem:[%s2718_s29 + $0xc5] sm:$0xff] }
  0x84   : > { %v549_v3 = vsel %vm385_vm0, %v317_v59, 0  ;;  %v1264_v59 = vld [vmem:[%s2718_s29 + $0x6c] sm:$0xff] }
  0x85   : > { %v1294_v60 = vpack.c.bf16 %v1264_v59, %v1263_v57  ;;  %v1669_v57 = vld [vmem:[%s2718_s29 + $0xd5] sm:$0xff]  ;;  %v1670_v59 = vld [vmem:[%s2718_s29 + $0xdd] sm:$0xff] }
  0x87   : > { %2268 = vmatpush3.bf16.xpose.msra.mxu1 %v540_v0  ;;  %v306_v0 = vld [vmem:[%s2718_s29 + $0x100] sm:$0xff] }
  0x88   : > { %2335 = vmatpush3.bf16.xpose.msra.mxu0 %v1134_v8  ;;  %2574 = vmatprep.subr.msk.bf16.mxu1 %vm385_vm0, %v323_v7  ;;  %v307_v7 = vld [vmem:[%s2718_s29 + $0x108] sm:$0xff]  ;;  %v1257_v8 = vld [vmem:[%s2718_s29 + $0x34] sm:$0xff] }
  0x89   : > { %2600 = vmatprep.subr.msk.bf16.mxu0 %vm385_vm0, %v1107_v10  ;;  %v1258_v10 = vld [vmem:[%s2718_s29 + $0x3c] sm:$0xff]  ;;  %v326_v11 = vpack.c.bf16 %v307_v7, %v306_v0  ;;  %v1265_v0 = vld [vmem:[%s2718_s29 + $0x74] sm:$0xff] }
  0x8a   : > { %v1291_v12 = vpack.c.bf16 %v1258_v10, %v1257_v8  ;;  %v1266_v7 = vld [vmem:[%s2718_s29 + $0x7c] sm:$0xff]  ;;  %v1283_v8 = vld [vmem:[%s2718_s29 + $0x104] sm:$0xff]  ;;  %v1284_v10 = vld [vmem:[%s2718_s29 + $0x10c] sm:$0xff] }
  0x8b   : > { %v576_v17 = vsel %vm385_vm0, %v326_v11, 0 }
  0x8c   : > { %v3035_v18 = vsel %vm385_vm0, %v1291_v12, 0  ;;  %v1304_v12 = vpack.c.bf16 %v1284_v10, %v1283_v8  ;;  %v1671_v10 = vld [vmem:[%s2718_s29 + $0xe5] sm:$0xff] }
  0x8f   : > { %2270 = vmatpush3.bf16.xpose.msra.mxu1 %v543_v26  ;;  %v1260_v26 = vld [vmem:[%s2718_s29 + $0x4c] sm:$0xff] }
  0x90   : > { %2337 = vmatpush3.bf16.xpose.msra.mxu0 %v1137_v28  ;;  %2575 = vmatprep.subr.msk.bf16.mxu1 %vm385_vm0, %v324_v27  ;;  %v327_v27 = vpack.c.bf16 %v309_v23, %v308_v21  ;;  %v1292_v28 = vpack.c.bf16 %v1260_v26, %v1259_v25  ;;  %v1089_v21 = vld [vmem:[%s2718_s29 + $0x11b] sm:$0xff]  ;;  %v1647_v23 = vld [vmem:[%s2718_s29 + $0x25] sm:$0xff]  ;;  %v1648_v25 = vld [vmem:[%s2718_s29 + $0x2d] sm:$0xff] }
  0x91   : > { %2601 = vmatprep.subr.msk.bf16.mxu0 %vm385_vm0, %v2982_v29 }
  0x92   : > { %v579_v36 = vsel %vm385_vm0, %v327_v27, 0  ;;  %v3055_v37 = vsel %vm385_vm0, %v1292_v28, 0  ;;  %v1683_v27 = vpack.c.bf16 %v1648_v25, %v1647_v23  ;;  %v1665_v28 = vld [vmem:[%s2718_s29 + $0xb5] sm:$0xff] }
  0x94   : > { %v1707_v33 = vsel %vm385_vm0, %v1683_v27, 0  ;;  %v1678_v27 = vld [vmem:[%s2718_s29 + $0x11d] sm:$0xff] }
  0x97   : > { %2272 = vmatpush3.bf16.xpose.msra.mxu1 %v546_v44  ;;  %2339 = vmatmul.mubr.msk.bf16.vlgmr.msra.gmra.mrb[0].mxu0 %vm385_vm0, %v2887_v22  ;;  %v1293_v44 = vpack.c.bf16 %v1262_v42, %v1261_v41  ;;  %v3189_v41 = vld [vmem:[%s3355_s1 + $0x1c] sm:$0xf] }
  0x98   : > { %2344 = vmatpush3.bf16.xpose.msra.mxu0 %v1313_v46  ;;  %2576 = vmatprep.subr.msk.bf16.mxu1 %vm385_vm0, %v325_v45  ;;  %v1279_v45 = vld [vmem:[%s2718_s29 + $0xe4] sm:$0xff]  ;;  %v1280_v46 = vld [vmem:[%s2718_s29 + $0xec] sm:$0xff] }
  0x99   : > { %2602 = vmatprep.subr.msk.bf16.mxu0 %vm385_vm0, %v2997_v51  ;;  %2359 = vmatprep.mubr.msk.bf16.mxu0 %vm385_vm0, %v3006_v58  ;;  %v1325_v55 = vsel %vm385_vm0, %v1293_v44, 0  ;;  %v1668_v44 = vld [vmem:[%s2718_s29 + $0xcd] sm:$0xff] }
  0x9f   : > { %2274 = vmatpush3.bf16.xpose.msra.mxu1 %v549_v3  ;;  %v1303_v3 = vpack.c.bf16 %v1282_v2, %v1281_v61  ;;  %v1694_v2 = vpack.c.bf16 %v1670_v59, %v1669_v57  ;;  %v1862_v57 = vld [vmem:[%s2718_s29 + $0xb6] sm:$0xff]  ;;  %v1863_v59 = vld [vmem:[%s2718_s29 + $0xbe] sm:$0xff] }
  0xa0   : > { %2346 = vmatpush3.bf16.xpose.msra.mxu0 %v3019_v4  ;;  %2435 = vmatprep.subr.bf16.mxu1 %v2653_v6 }
  0xa1   : > { %2603 = vmatprep.subr.msk.bf16.mxu0 %vm385_vm0, %v3021_v5 }
  0xa6   : > { %2276 = vmatmul.mubr.msk.bf16.vlgmr.msra.gmra.mrb[0].mxu1 %vm385_vm0, %v2915_v54 }
  0xa7   : > { %2436 = vmatpush3.bf16.xpose.msra.mxu1 %v576_v17  ;;  %2439 = vmatprep.mubr.msk.bf16.mxu1 %vm2654_vm1, %v2653_v6  ;;  %v1531_v17 = vsel %vm385_vm0, %v2982_v29, 0 }
  0xa8   : > { %2348 = vmatpush3.bf16.xpose.msra.mxu0 %v3035_v18  ;;  %2437 = vmatprep.subr.bf16.mxu1 %v2653_v6 }
  0xa9   : > { %2604 = vmatprep.subr.msk.bf16.mxu0 %vm385_vm0, %v3037_v19 }
  0xaf   : > { %2438 = vmatpush3.bf16.xpose.msra.mxu1 %v579_v36  ;;  %v1692_v36 = vpack.c.bf16 %v1666_v30, %v1665_v28 }
  0xb0   : > { %2350 = vmatpush3.bf16.xpose.msra.mxu0 %v3055_v37  ;;  %2577 = vmatprep.subr.msk.bf16.mxu1 %vm385_vm0, %v2859_v56  ;;  %v1302_v56 = vpack.c.bf16 %v1280_v46, %v1279_v45 }
  0xb1   : > { %2605 = vmatprep.subr.msk.bf16.mxu0 %vm385_vm0, %v3057_v38 }
  0xb6   : > { %2440 = vmatmul.mubr.msk.bf16.vlgmr.msra.gmra.mrb[4].mxu1 %vm385_vm0, %v2915_v54  ;;  %v1328_v54 = vsel %vm385_vm0, %v1294_v60, 0 }
  0xb7   : > { %2281 = vmatpush3.bf16.xpose.msra.mxu1 %v722_v52  ;;  %2296 = vmatprep.mubr.msk.bf16.mxu1 %vm385_vm0, %v3074_v53  ;;  %v1693_v52 = vpack.c.bf16 %v1668_v44, %v1667_v43 }
  0xb8   : > { %2352 = vmatpush3.bf16.xpose.msra.mxu0 %v1325_v55  ;;  %2578 = vmatprep.subr.msk.bf16.mxu1 %vm385_vm0, %v2726_v9  ;;  %v1295_v9 = vpack.c.bf16 %v1266_v7, %v1265_v0  ;;  %v1653_v0 = vld [vmem:[%s2718_s29 + $0x55] sm:$0xff]  ;;  %v1654_v7 = vld [vmem:[%s2718_s29 + $0x5d] sm:$0xff] }
  0xb9   : > { %2606 = vmatprep.subr.msk.bf16.mxu0 %vm385_vm0, %v1302_v56  ;;  %v1686_v8 = vpack.c.bf16 %v1654_v7, %v1653_v0  ;;  %v1846_v0 = vld [vmem:[%s2718_s29 + $0x36] sm:$0xff]  ;;  %v1847_v7 = vld [vmem:[%s2718_s29 + $0x3e] sm:$0xff] }
  0xba   : > { %v1331_v11 = vsel %vm385_vm0, %v1295_v9, 0 }
  0xbf   : > { %2283 = vmatpush3.bf16.xpose.msra.mxu1 %v2744_v24  ;;  %v1296_v24 = vpack.c.bf16 %v1268_v14, %v1267_v13  ;;  %v1655_v14 = vld [vmem:[%s2718_s29 + $0x65] sm:$0xff] }
  0xc0   : > { %2354 = vmatpush3.bf16.xpose.msra.mxu0 %v1328_v54  ;;  %2579 = vmatprep.subr.msk.bf16.mxu1 %vm385_vm0, %v2738_v20 }
  0xc1   : > { %2607 = vmatprep.subr.msk.bf16.mxu0 %vm385_vm0, %v1303_v3  ;;  %v1334_v20 = vsel %vm385_vm0, %v1296_v24, 0  ;;  %v1656_v24 = vld [vmem:[%s2718_s29 + $0x6d] sm:$0xff] }
  0xc7   : > { %2285 = vmatpush3.bf16.xpose.msra.mxu1 %v2757_v34  ;;  %v3113_v34 = vld [vmem:[%s3355_s1 + $0x18] sm:$0xf] }
  0xc8   : > { %2356 = vmatpush3.bf16.xpose.msra.mxu0 %v1331_v11  ;;  %2580 = vmatprep.subr.msk.bf16.mxu1 %vm385_vm0, %v2759_v35  ;;  %v770_v35 = vsel %vm385_vm0, %v2849_v50, 0 }
  0xc9   : > { %2608 = vmatprep.subr.msk.bf16.mxu0 %vm385_vm0, %v1304_v12 }
  0xcf   : > { %2287 = vmatpush3.bf16.xpose.msra.mxu1 %v2775_v48  ;;  %v696_v48 = vld [vmem:[%s2718_s29 + $0x112] sm:$0xff] }
  0xd0   : > { %2358 = vmatpush3.bf16.xpose.msra.mxu0 %v1334_v20  ;;  %2581 = vmatprep.subr.msk.bf16.mxu1 %vm385_vm0, %v2777_v49  ;;  %v697_v49 = vld [vmem:[%s2718_s29 + $0x11a] sm:$0xff] }
  0xd1   : > { %2609 = vmatprep.subr.msk.bf16.mxu0 %vm385_vm0, %v2997_v51  ;;  %v1663_v51 = vld [vmem:[%s2718_s29 + $0xa5] sm:$0xff] }
  0xd7   : > { %2289 = vmatpush3.bf16.xpose.msra.mxu1 %v2793_v62  ;;  %2360 = vmatmul.mubr.msk.bf16.vlgmr.msra.gmra.mrb[0].mxu0 %vm385_vm0, %v3006_v58  ;;  %v715_v62 = vpack.c.bf16 %v697_v49, %v696_v48  ;;  %v1674_v48 = vld [vmem:[%s2718_s29 + $0xfd] sm:$0xff] }
  0xd8   : > { %2365 = vmatpush3.bf16.xpose.msra.mxu0 %v3019_v4  ;;  %2582 = vmatprep.subr.msk.bf16.mxu1 %vm385_vm0, %v2795_v63  ;;  %v1664_v4 = vld [vmem:[%s2718_s29 + $0xad] sm:$0xff] }
  0xd9   : > { %2610 = vmatprep.subr.msk.bf16.mxu0 %vm385_vm0, %v3021_v5  ;;  %2380 = vmatprep.mubr.msk.bf16.mxu0 %vm385_vm0, %v3113_v34  ;;  %v773_v63 = vsel %vm385_vm0, %v715_v62, 0 }
  0xdf   : > { %2291 = vmatpush3.bf16.xpose.msra.mxu1 %v2811_v15  ;;  %v1480_v15 = vld [vmem:[%s2718_s29 + $0x114] sm:$0xff] }
  0xe0   : > { %2367 = vmatpush3.bf16.xpose.msra.mxu0 %v3035_v18  ;;  %2583 = vmatprep.subr.msk.bf16.mxu1 %vm385_vm0, %v2813_v16  ;;  %v1481_v16 = vld [vmem:[%s2718_s29 + $0x11c] sm:$0xff]  ;;  %v1691_v18 = vpack.c.bf16 %v1664_v4, %v1663_v51 }
  0xe1   : > { %2611 = vmatprep.subr.msk.bf16.mxu0 %vm385_vm0, %v3037_v19  ;;  %v1088_v19 = vld [vmem:[%s2718_s29 + $0x113] sm:$0xff] }
  0xe2   : > { %v1108_v26 = vpack.c.bf16 %v1089_v21, %v1088_v19  ;;  %v1659_v19 = vld [vmem:[%s2718_s29 + $0x85] sm:$0xff]  ;;  %v1660_v21 = vld [vmem:[%s2718_s29 + $0x8d] sm:$0xff] }
  0xe3   : > { %v1689_v25 = vpack.c.bf16 %v1660_v21, %v1659_v19  ;;  %v1854_v19 = vld [vmem:[%s2718_s29 + $0x76] sm:$0xff]  ;;  %v1855_v21 = vld [vmem:[%s2718_s29 + $0x7e] sm:$0xff] }
  0xe4   : > { %v1164_v29 = vsel %vm385_vm0, %v1108_v26, 0  ;;  %v1677_v26 = vld [vmem:[%s2718_s29 + $0x115] sm:$0xff] }
  0xe5   : > { %v1725_v30 = vsel %vm385_vm0, %v1689_v25, 0  ;;  %v1872_v25 = vld [vmem:[%s2718_s29 + $0x106] sm:$0xff] }
  0xe7   : > { %2293 = vmatpush3.bf16.xpose.msra.mxu1 %v2829_v31  ;;  %v1501_v31 = vpack.c.bf16 %v1481_v16, %v1480_v15  ;;  %v1485_v15 = vld [vmem:[%s2718_s29 + $0x13c] sm:$0xff] }
  0xe8   : > { %2369 = vmatpush3.bf16.xpose.msra.mxu0 %v3055_v37  ;;  %2584 = vmatprep.subr.msk.bf16.mxu1 %vm385_vm0, %v2831_v32  ;;  %v893_v32 = vld [vmem:[%s2718_s29 + $0x122] sm:$0xff]  ;;  %v1657_v16 = vld [vmem:[%s2718_s29 + $0x75] sm:$0xff] }
  0xe9   : > { %2612 = vmatprep.subr.msk.bf16.mxu0 %vm385_vm0, %v3057_v38  ;;  %v1090_v37 = vld [vmem:[%s2718_s29 + $0x123] sm:$0xff]  ;;  %v1091_v38 = vld [vmem:[%s2718_s29 + $0x12b] sm:$0xff]  ;;  %v1361_v60 = vsel %vm385_vm0, %v1501_v31, 0 }
  0xea   : > { %v1109_v42 = vpack.c.bf16 %v1091_v38, %v1090_v37  ;;  %v1661_v37 = vld [vmem:[%s2718_s29 + $0x95] sm:$0xff]  ;;  %v1662_v38 = vld [vmem:[%s2718_s29 + $0x9d] sm:$0xff] }
  0xec   : > { %v1167_v45 = vsel %vm385_vm0, %v1109_v42, 0  ;;  %v1860_v42 = vld [vmem:[%s2718_s29 + $0xa6] sm:$0xff] }
  0xef   : > { %2295 = vmatpush3.bf16.xpose.msra.mxu1 %v2847_v47  ;;  %v894_v47 = vld [vmem:[%s2718_s29 + $0x12a] sm:$0xff] }
  0xf0   : > { %2371 = vmatpush3.bf16.xpose.msra.mxu0 %v1325_v55  ;;  %2443 = vmatprep.subr.bf16.mxu1 %v2653_v6  ;;  %v912_v50 = vpack.c.bf16 %v894_v47, %v893_v32  ;;  %v1652_v55 = vld [vmem:[%s2718_s29 + $0x4d] sm:$0xff] }
  0xf1   : > { %2613 = vmatprep.subr.msk.bf16.mxu0 %vm385_vm0, %v1302_v56 }
  0xf2   : > { %v970_v5 = vsel %vm385_vm0, %v912_v50, 0  ;;  %v1675_v50 = vld [vmem:[%s2718_s29 + $0x105] sm:$0xff] }
  0xf6   : > { %2297 = vmatmul.mubr.msk.bf16.vlgmr.msra.gmra.mrb[0].mxu1 %vm385_vm0, %v3074_v53 }
  0xf7   : > { %2444 = vmatpush3.bf16.xpose.msra.mxu1 %v770_v35  ;;  %2447 = vmatprep.mubr.msk.bf16.mxu1 %vm2654_vm1, %v2653_v6  ;;  %v1673_v35 = vld [vmem:[%s2718_s29 + $0xf5] sm:$0xff] }
  0xf8   : > { %2373 = vmatpush3.bf16.xpose.msra.mxu0 %v1328_v54  ;;  %2445 = vmatprep.subr.bf16.mxu1 %v2653_v6  ;;  %v1287_v54 = vld [vmem:[%s2718_s29 + $0x124] sm:$0xff]  ;;  %v1696_v62 = vpack.c.bf16 %v1674_v48, %v1673_v35 }
  0xf9   : > { %2614 = vmatprep.subr.msk.bf16.mxu0 %vm385_vm0, %v1303_v3  ;;  %v1288_v3 = vld [vmem:[%s2718_s29 + $0x12c] sm:$0xff]  ;;  %v1867_v35 = vld [vmem:[%s2718_s29 + $0xde] sm:$0xff] }
  0xfa   : > { %v1306_v9 = vpack.c.bf16 %v1288_v3, %v1287_v54  ;;  %v1878_v54 = vld [vmem:[%s2718_s29 + $0x136] sm:$0xff]  ;;  %v1879_v3 = vld [vmem:[%s2718_s29 + $0x13e] sm:$0xff] }
  0xff   : > { %2446 = vmatpush3.bf16.xpose.msra.mxu1 %v773_v63 }
 0x100   : > { %2375 = vmatpush3.bf16.xpose.msra.mxu0 %v1331_v11  ;;  %2451 = vmatprep.subr.bf16.mxu1 %v2653_v6  ;;  %v1672_v11 = vld [vmem:[%s2718_s29 + $0xed] sm:$0xff] }
 0x101   : > { %2615 = vmatprep.subr.msk.bf16.mxu0 %vm385_vm0, %v1304_v12  ;;  %v1716_v12 = vsel %vm385_vm0, %v1686_v8, 0  ;;  %v1695_v13 = vpack.c.bf16 %v1672_v11, %v1671_v10  ;;  %v1881_v8 = vpack.c.bf16 %v1847_v7, %v1846_v0  ;;  %v2233_v10 = vld [vmem:[%s3355_s1 + $0x20] sm:$0xf]  ;;  %v1864_v11 = vld [vmem:[%s2718_s29 + $0xc6] sm:$0xff] }
 0x106   : > { %2448 = vmatmul.mubr.msk.bf16.vlgmr.msra.gmra.mrb[4].mxu1 %vm385_vm0, %v3074_v53  ;;  %v1651_v53 = vld [vmem:[%s2718_s29 + $0x45] sm:$0xff] }
 0x107   : > { %2452 = vmatpush3.bf16.xpose.msra.mxu1 %v773_v63  ;;  %2455 = vmatprep.mubr.msk.bf16.mxu1 %vm2654_vm1, %v2653_v6  ;;  %v1685_v56 = vpack.c.bf16 %v1652_v55, %v1651_v53  ;;  %v1484_v63 = vld [vmem:[%s2718_s29 + $0x134] sm:$0xff] }
 0x108   : > { %2377 = vmatpush3.bf16.xpose.msra.mxu0 %v1334_v20  ;;  %2453 = vmatprep.subr.bf16.mxu1 %v2653_v6  ;;  %v1687_v20 = vpack.c.bf16 %v1656_v24, %v1655_v14  ;;  %v1503_v32 = vpack.c.bf16 %v1485_v15, %v1484_v63  ;;  %v1845_v53 = vld [vmem:[%s2718_s29 + $0x2e] sm:$0xff]  ;;  %v1848_v14 = vld [vmem:[%s2718_s29 + $0x46] sm:$0xff]  ;;  %v1851_v63 = vld [vmem:[%s2718_s29 + $0x5e] sm:$0xff] }
 0x109   : > { %2616 = vmatprep.subr.msk.bf16.mxu0 %vm385_vm0, %v1501_v31  ;;  %v1713_v61 = vsel %vm385_vm0, %v1685_v56, 0  ;;  %v1658_v31 = vld [vmem:[%s2718_s29 + $0x7d] sm:$0xff]  ;;  %v1849_v24 = vld [vmem:[%s2718_s29 + $0x4e] sm:$0xff] }
 0x10a   : > { %v1719_v49 = vsel %vm385_vm0, %v1687_v20, 0  ;;  %v1688_v47 = vpack.c.bf16 %v1658_v31, %v1657_v16  ;;  %v1561_v51 = vsel %vm385_vm0, %v1503_v32, 0  ;;  %v1866_v20 = vld [vmem:[%s2718_s29 + $0xd6] sm:$0xff]  ;;  %v1868_v16 = vld [vmem:[%s2718_s29 + $0xe6] sm:$0xff]  ;;  %v1869_v31 = vld [vmem:[%s2718_s29 + $0xee] sm:$0xff] }
 0x10c   : > { %v1722_v4 = vsel %vm385_vm0, %v1688_v47, 0  ;;  %v1892_v47 = vpack.c.bf16 %v1869_v31, %v1868_v16 }
 0x10f   : > { %2454 = vmatpush3.bf16.xpose.msra.mxu1 %v970_v5 }
 0x110   : > { %2379 = vmatpush3.bf16.xpose.msra.mxu0 %v1531_v17  ;;  %2459 = vmatprep.subr.bf16.mxu1 %v2653_v6  ;;  %v1679_v17 = vld [vmem:[%s2718_s29 + $0x125] sm:$0xff] }
 0x111   : > { %2617 = vmatprep.subr.msk.bf16.mxu0 %vm385_vm0, %v1691_v18  ;;  %v1680_v18 = vld [vmem:[%s2718_s29 + $0x12d] sm:$0xff] }
 0x112   : > { %v1699_v23 = vpack.c.bf16 %v1680_v18, %v1679_v17 }
 0x114   : > { %v1755_v28 = vsel %vm385_vm0, %v1699_v23, 0  ;;  %v1885_v23 = vpack.c.bf16 %v1855_v21, %v1854_v19 }
 0x116   : > { %2456 = vmatmul.mubr.msk.bf16.vlgmr.msra.gmra.mrb[4].mxu1 %vm385_vm0, %v2708_v1  ;;  %v1684_v1 = vpack.c.bf16 %v1650_v40, %v1649_v39  ;;  %v1690_v40 = vpack.c.bf16 %v1662_v38, %v1661_v37  ;;  %v1875_v37 = vld [vmem:[%s2718_s29 + $0x11e] sm:$0xff] }
 0x117   : > { %2460 = vmatpush3.bf16.xpose.msra.mxu1 %v1164_v29  ;;  %2381 = vmatmul.mubr.msk.bf16.vlgmr.msra.gmra.mrb[0].mxu0 %vm385_vm0, %v3113_v34  ;;  %v1698_v29 = vpack.c.bf16 %v1678_v27, %v1677_v26  ;;  %v1873_v26 = vld [vmem:[%s2718_s29 + $0x10e] sm:$0xff]  ;;  %v1919_v27 = vsel %vm385_vm0, %v1885_v23, 0 }
 0x118   : > { %2386 = vmatpush3.bf16.xpose.msra.mxu0 %v1707_v33  ;;  %2461 = vmatprep.subr.bf16.mxu1 %v2653_v6  ;;  %v1710_v46 = vsel %vm385_vm0, %v1684_v1, 0  ;;  %v1681_v33 = vld [vmem:[%s2718_s29 + $0x135] sm:$0xff]  ;;  %v1728_v43 = vsel %vm385_vm0, %v1690_v40, 0 }
 0x119   : > { %2618 = vmatprep.subr.msk.bf16.mxu0 %vm385_vm0, %v1692_v36  ;;  %2463 = vmatprep.mubr.msk.bf16.mxu1 %vm2654_vm1, %v2653_v6  ;;  %v1682_v36 = vld [vmem:[%s2718_s29 + $0x13d] sm:$0xff] }
 0x11a   : > { %2401 = vmatprep.mubr.msk.bf16.mxu0 %vm385_vm0, %v3189_v41  ;;  %v1700_v39 = vpack.c.bf16 %v1682_v36, %v1681_v33  ;;  %v1874_v36 = vld [vmem:[%s2718_s29 + $0x116] sm:$0xff] }
 0x11b   : > { %v1858_v40 = vld [vmem:[%s2718_s29 + $0x96] sm:$0xff] }
 0x11c   : > { %v1758_v1 = vsel %vm385_vm0, %v1700_v39, 0  ;;  %v1895_v39 = vpack.c.bf16 %v1875_v37, %v1874_v36 }
 0x11f   : > { %2462 = vmatpush3.bf16.xpose.msra.mxu1 %v1167_v45  ;;  %v1876_v45 = vld [vmem:[%s2718_s29 + $0x126] sm:$0xff] }
 0x120   : > { %2388 = vmatpush3.bf16.xpose.msra.mxu0 %v1710_v46  ;;  %2467 = vmatprep.subr.bf16.mxu1 %v2653_v6  ;;  %v1877_v46 = vld [vmem:[%s2718_s29 + $0x12e] sm:$0xff] }
 0x121   : > { %2619 = vmatprep.subr.msk.bf16.mxu0 %vm385_vm0, %v1693_v52  ;;  %v1844_v52 = vld [vmem:[%s2718_s29 + $0x26] sm:$0xff]  ;;  %v1896_v55 = vpack.c.bf16 %v1877_v46, %v1876_v45 }
 0x122   : > { %v1880_v56 = vpack.c.bf16 %v1845_v53, %v1844_v52 }
 0x126   : > { %2464 = vmatmul.mubr.msk.bf16.vlgmr.msra.gmra.mrb[4].mxu1 %vm385_vm0, %v2887_v22  ;;  %v1364_v22 = vsel %vm385_vm0, %v1306_v9, 0  ;;  %v1897_v9 = vpack.c.bf16 %v1879_v3, %v1878_v54 }
 0x127   : > { %2468 = vmatpush3.bf16.xpose.msra.mxu1 %v1361_v60  ;;  %2471 = vmatprep.mubr.msk.bf16.mxu1 %vm2654_vm1, %v2653_v6  ;;  %v1952_v60 = vsel %vm385_vm0, %v1896_v55, 0 }
 0x128   : > { %2390 = vmatpush3.bf16.xpose.msra.mxu0 %v1713_v61  ;;  %2469 = vmatprep.subr.bf16.mxu1 %v2653_v6  ;;  %v1904_v61 = vsel %vm385_vm0, %v1880_v56, 0 }
 0x129   : > { %2620 = vmatprep.subr.msk.bf16.mxu0 %vm385_vm0, %v1694_v2  ;;  %v1889_v2 = vpack.c.bf16 %v1863_v59, %v1862_v57  ;;  %v2047_v57 = vlaneseq }
 0x12b   : > { %v2048_v59 = vshrl.u32 %v2047_v57, 7 }
 0x12d   : > { %v2053_v54 = vsub.s32 1, %v2048_v59 }
 0x12f   : > { %2470 = vmatpush3.bf16.xpose.msra.mxu1 %v1364_v22 }
 0x130   : > { %2392 = vmatpush3.bf16.xpose.msra.mxu0 %v1716_v12  ;;  %2475 = vmatprep.subr.bf16.mxu1 %v2653_v6  ;;  %v1907_v12 = vsel %vm385_vm0, %v1881_v8, 0 }
 0x131   : > { %2621 = vmatprep.subr.msk.bf16.mxu0 %vm385_vm0, %v1695_v13 }
 0x136   : > { %2472 = vmatmul.mubr.msk.bf16.vlgmr.msra.gmra.mrb[4].mxu1 %vm385_vm0, %v3006_v58  ;;  %v1676_v58 = vld [vmem:[%s2718_s29 + $0x10d] sm:$0xff] }
 0x137   : > { %2476 = vmatpush3.bf16.xpose.msra.mxu1 %v1364_v22  ;;  %2479 = vmatprep.mubr.msk.bf16.mxu1 %vm2654_vm1, %v2653_v6  ;;  %v1697_v5 = vpack.c.bf16 %v1676_v58, %v1675_v50  ;;  %v1955_v22 = vsel %vm385_vm0, %v1897_v9, 0  ;;  %v1852_v50 = vld [vmem:[%s2718_s29 + $0x66] sm:$0xff]  ;;  %v1853_v58 = vld [vmem:[%s2718_s29 + $0x6e] sm:$0xff] }
 0x138   : > { %2394 = vmatpush3.bf16.xpose.msra.mxu0 %v1719_v49  ;;  %2477 = vmatprep.subr.bf16.mxu1 %v2653_v6  ;;  %v1891_v49 = vpack.c.bf16 %v1867_v35, %v1866_v20 }
 0x139   : > { %2622 = vmatprep.subr.msk.bf16.mxu0 %vm385_vm0, %v1696_v62  ;;  %v1850_v62 = vld [vmem:[%s2718_s29 + $0x56] sm:$0xff] }
 0x13a   : > { %v1883_v15 = vpack.c.bf16 %v1851_v63, %v1850_v62 }
 0x13c   : > { %v1913_v32 = vsel %vm385_vm0, %v1883_v15, 0 }
 0x13f   : > { %2478 = vmatpush3.bf16.xpose.msra.mxu1 %v1561_v51  ;;  %v1884_v51 = vpack.c.bf16 %v1853_v58, %v1852_v50 }
 0x140   : > { %2396 = vmatpush3.bf16.xpose.msra.mxu0 %v1722_v4  ;;  %2483 = vmatprep.subr.bf16.mxu1 %v2653_v6  ;;  %v1870_v4 = vld [vmem:[%s2718_s29 + $0xf6] sm:$0xff] }
 0x141   : > { %2623 = vmatprep.subr.msk.bf16.mxu0 %vm385_vm0, %v1697_v5  ;;  %v1871_v5 = vld [vmem:[%s2718_s29 + $0xfe] sm:$0xff]  ;;  %v1916_v17 = vsel %vm385_vm0, %v1884_v51, 0 }
 0x142   : > { %v1893_v18 = vpack.c.bf16 %v1871_v5, %v1870_v4 }
 0x146   : > { %2480 = vmatmul.mubr.msk.bf16.vlgmr.msra.gmra.mrb[4].mxu1 %vm385_vm0, %v3113_v34  ;;  %v1861_v34 = vld [vmem:[%s2718_s29 + $0xae] sm:$0xff] }
 0x147   : > { %2484 = vmatpush3.bf16.xpose.msra.mxu1 %v1755_v28  ;;  %2487 = vmatprep.mubr.msk.bf16.mxu1 %vm2654_vm1, %v2653_v6  ;;  %v1888_v44 = vpack.c.bf16 %v1861_v34, %v1860_v42  ;;  %v1894_v28 = vpack.c.bf16 %v1873_v26, %v1872_v25  ;;  %v1859_v42 = vld [vmem:[%s2718_s29 + $0x9e] sm:$0xff] }
 0x148   : > { %2398 = vmatpush3.bf16.xpose.msra.mxu0 %v1725_v30  ;;  %2485 = vmatprep.subr.bf16.mxu1 %v2653_v6  ;;  %v1856_v30 = vld [vmem:[%s2718_s29 + $0x86] sm:$0xff]  ;;  %v1887_v34 = vpack.c.bf16 %v1859_v42, %v1858_v40 }
 0x149   : > { %2624 = vmatprep.subr.msk.bf16.mxu0 %vm385_vm0, %v1698_v29  ;;  %v1857_v29 = vld [vmem:[%s2718_s29 + $0x8e] sm:$0xff] }
 0x14a   : > { %v1886_v33 = vpack.c.bf16 %v1857_v29, %v1856_v30 }
 0x14c   : > { %v1922_v38 = vsel %vm385_vm0, %v1886_v33, 0 }
 0x14f   : > { %2486 = vmatpush3.bf16.xpose.msra.mxu1 %v1758_v1  ;;  %v1925_v1 = vsel %vm385_vm0, %v1887_v34, 0 }
 0x150   : > { %2400 = vmatpush3.bf16.xpose.msra.mxu0 %v1728_v43  ;;  %2491 = vmatprep.subr.bf16.mxu1 %v2653_v6 }
 0x151   : > { %2625 = vmatprep.subr.msk.bf16.mxu0 %vm385_vm0, %v1888_v44 }
 0x156   : > { %2488 = vmatmul.mubr.msk.bf16.vlgmr.msra.gmra.mrb[4].mxu1 %vm385_vm0, %v3189_v41 }
 0x157   : > { %2402 = vmatmul.mubr.msk.bf16.vlgmr.msra.gmra.mrb[0].mxu0 %vm385_vm0, %v3189_v41  ;;  %2492 = vmatpush3.bf16.xpose.msra.mxu1 %v1952_v60  ;;  %v1865_v41 = vld [vmem:[%s2718_s29 + $0xce] sm:$0xff]  ;;  %v2049_v60 = vsub.s32 0, %v2048_v59 }
 0x158   : > { %2407 = vmatpush3.bf16.xpose.msra.mxu0 %v1904_v61  ;;  %2493 = vmatprep.subr.bf16.mxu1 %v2653_v6  ;;  %v1890_v13 = vpack.c.bf16 %v1865_v41, %v1864_v11  ;;  %v2057_v61 = vsub.s32 2, %v2048_v59 }
 0x159   : > { %2626 = vmatprep.subr.msk.bf16.mxu0 %vm385_vm0, %v1889_v2  ;;  %2495 = vmatprep.mubr.msk.bf16.mxu1 %vm2654_vm1, %v2653_v6  ;;  %v1882_v6 = vpack.c.bf16 %v1849_v24, %v1848_v14  ;;  %v2045_v2 = vld [vmem:[%s3357_s3] sm:$0x7] }
 0x15a   : > { %2422 = vmatprep.mubr.msk.bf16.mxu0 %vm385_vm0, %v2233_v10  ;;  %v2050_v3 = vrot.slane %v2045_v2, %v2049_v60  ;;  %v2058_v0 = vrot.slane %v2045_v2, %v2057_v61  ;;  %v2054_v9 = vrot.slane %v2045_v2, %v2053_v54 }
 0x15b   : > { %v1910_v48 = vsel %vm385_vm0, %v1882_v6, 0 }
 0x15f   : > { %2494 = vmatpush3.bf16.xpose.msra.mxu1 %v1955_v22 }
 0x160   : > { %2409 = vmatpush3.bf16.xpose.msra.mxu0 %v1907_v12 }
 0x161   : > { %2627 = vmatprep.subr.msk.bf16.mxu0 %vm385_vm0, %v1890_v13 }
 0x166   : > { %2496 = vmatmul.mubr.msk.bf16.vlgmr.msra.gmra.mrb[4].mxu1 %vm385_vm0, %v2233_v10 }
 0x168   : > { %2411 = vmatpush3.bf16.xpose.msra.mxu0 %v1910_v48 }
 0x169   : > { %2628 = vmatprep.subr.msk.bf16.mxu0 %vm385_vm0, %v1891_v49 }
 0x170   : > { %2413 = vmatpush3.bf16.xpose.msra.mxu0 %v1913_v32 }
 0x171   : > { %2629 = vmatprep.subr.msk.bf16.mxu0 %vm385_vm0, %v1892_v47 }
 0x178   : > { %2415 = vmatpush3.bf16.xpose.msra.mxu0 %v1916_v17 }
 0x179   : > { %2630 = vmatprep.subr.msk.bf16.mxu0 %vm385_vm0, %v1893_v18 }
 0x180   : > { %2417 = vmatpush3.bf16.xpose.msra.mxu0 %v1919_v27 }
 0x181   : > { %2631 = vmatprep.subr.msk.bf16.mxu0 %vm385_vm0, %v1894_v28 }
 0x188   : > { %2419 = vmatpush3.bf16.xpose.msra.mxu0 %v1922_v38 }
 0x189   : > { %2632 = vmatprep.subr.msk.bf16.mxu0 %vm385_vm0, %v1895_v39 }
 0x190   : > { %2421 = vmatpush3.bf16.xpose.msra.mxu0 %v1925_v1 }
 0x197   : > { %2423 = vmatmul.mubr.msk.bf16.vlgmr.msra.gmra.mrb[0].mxu0 %vm385_vm0, %v2233_v10 }
 0x1c9   : > { %v809_v43 = vpop.f32.mrb[0].mxu1 }
 0x1ca   : > { %v811_v44 = vpop.f32.mrb[1].mxu1 }
 0x1cb   : > { %v813_v45 = vpop.f32.mrb[2].mxu1 }
 0x1cc   : > { %v814_v46 = vpop.f32.mrb[3].mxu1 }
 0x239   : > { %v2032_v52 = vpop.f32.mrb[4].mxu1 }
 0x23a   : > { %v2497_v53 = vpop.f32.mrb[5].mxu1  ;;  %2044 = vst.msk [vmem:[%s264_s24 + $0x10] sm:$0xff] %vm2043_vm2, %v2032_v52  ;;  %v2074_v8 = vmul.f32 %v2032_v52, %v2032_v52  ;;  %v2064_v24 = vmul.f32 %v2058_v0, %v2032_v52 }
 0x23b   : > { %v2035_v55 = vpop.f32.mrb[6].mxu1 }
 0x23c   : > { %v2498_v56 = vpop.f32.mrb[7].mxu1  ;;  %v2077_v48 = vmul.f32 %v2074_v8, %v2058_v0  ;;  %v2066_v63 = vsel %vm2043_vm2, %v2064_v24, 0.0 }
 0x23e   : > { %v2079_v31 = vsel %vm2043_vm2, %v2077_v48, 0.0 }
 0x26a   : > { %v1991_v7 = vpop.f32.mrb[0].mxu0 }
 0x26b   : > { %v2499_v10 = vadd.f32 %v1991_v7, %v809_v43  ;;  %v1993_v11 = vpop.f32.mrb[1].mxu0 }
 0x26c   : > { %v2500_v41 = vadd.f32 %v1993_v11, %v811_v44  ;;  %v1995_v22 = vpop.f32.mrb[2].mxu0 }
 0x26d   : > { %2041 = vst [vmem:[%s264_s24] sm:$0xff] %v2499_v10  ;;  %v2072_v12 = vmul.f32 %v2499_v10, %v2499_v10  ;;  %v1996_v13 = vpop.f32.mrb[3].mxu0  ;;  %v2062_v14 = vmul.f32 %v2499_v10, %v2050_v3 }
 0x26e   : > { %2042 = vst [vmem:[%s264_s24 + $0x8] sm:$0xff] %v2500_v41  ;;  %v2073_v6 = vmul.f32 %v2500_v41, %v2500_v41  ;;  %v2063_v20 = vmul.f32 %v2500_v41, %v2054_v9 }
 0x26f   : > { %v2075_v35 = vmul.f32 %v2072_v12, %v2050_v3 }
 0x270   : > { %v2065_v49 = vadd.f32 %v2063_v20, %v2062_v14  ;;  %v2076_v62 = vmul.f32 %v2073_v6, %v2054_v9 }
 0x272   : > { %v2067_v15 = vadd.f32 %v2066_v63, %v2065_v49  ;;  %v2078_v16 = vadd.f32 %v2076_v62, %v2075_v35 }
 0x274   : > { %2068 = vadd.xlane.f32.xlu0 %v2067_v15  ;;  %v2080_v32 = vadd.f32 %v2079_v31, %v2078_v16 }
 0x278   : > { %2081 = vadd.xlane.f32.xlu0 %v2080_v32 }
 0x301   : > { %v2069_v47 = vpop.xlane.xlu0 %2068 }
 0x302   : > { %2071 = vst.msk [vmem:[%s268_s30] sm:$0xff] %vm2070_vm3, %v2069_v47 }
 0x305   : > { %v2082_v50 = vpop.xlane.xlu0 %2081 }
 0x306   : > { %2083 = vst.msk [vmem:[%s272_s9] sm:$0xff] %vm2070_vm3, %v2082_v50 }
 0x307 PF: > { %s17_s21 = sadd.s32 1, %s2651_s21  }
 0x308   : > { %p14_p4 = scmp.ge.s32.totalorder %s17_s21, 4  }
 0x30a   :  { %16 = sbr.rel (!%p14_p4) target bundleno = 1 (0x1), region = 98 }

</bundles_post_ra>
